<compile_context>
chip_gen: v6e
topology: v6e:2x2x1
jax: 0.10.0
libtpu: 0.0.40
codegen_flags: <defaults>
</compile_context>

<pallas_src>
import functools

import jax
import jax.numpy as jnp
from jax.experimental import pallas as pl
from jax.experimental.pallas import tpu as pltpu


def _round_up(x, m):
    return ((x + m - 1) // m) * m


# --------------------------------------------------------------------------
# Fused TCN kernel
# --------------------------------------------------------------------------
def _tcn_stack_kernel(x_ref, *refs, layer_meta, K, L, R, cpad, c_out_pad,
                      concat_taps):
    """Fused TCN forward for one (R = bt*L, cpad) row tile.

    x_ref      : (R, cpad) f32, channel-padded input rows (batch-major rows:
                 r = b*L + t).
    refs       : per-layer (w1, b1, w2, b2[, wd, bd]) refs, then out_ref last.
    layer_meta : static tuple of (dilation, ds_mode) per layer where ds_mode
                 is one of "none" / "fused" / "separate".
    """
    out_ref = refs[-1]
    wrefs = refs[:-1]

    # Time index of each flattened row.
    t_idx = jax.lax.broadcasted_iota(jnp.int32, (R, 1), 0) % L

    # Hoist causal-validity masks once per distinct shift (JAX does not CSE
    # broadcast_in_dim; conv1/conv2 of a layer share the same shifts, and
    # small shifts repeat across layers).
    shift_vals = sorted({k * d for d, _ in layer_meta
                         for k in range(1, K) if k * d < L})
    masks = {s: t_idx >= s for s in shift_vals}

    def tap_bf16(h, s):
        """bf16 copy of h shifted down by s rows within each batch element."""
        if s == 0:
            return h.astype(jnp.bfloat16)
        if s >= L:
            # Receptive field entirely out of range for every row -> zeros.
            return jnp.zeros((R, cpad), jnp.bfloat16)
        # XLU sublane rotation (free slot) + causal row mask; rows with
        # t < s would otherwise see wrapped / cross-batch data, mask them.
        rolled = pltpu.roll(h, shift=s, axis=0)
        return jnp.where(masks[s], rolled, 0.0).astype(jnp.bfloat16)

    def causal_conv(h, w_ref, b_ref, dilation):
        taps = [tap_bf16(h, k * dilation) for k in range(K)]
        if concat_taps:
            # Small-channel regime: one dot with K*cpad-deep contraction.
            cat = jnp.concatenate(taps, axis=-1) if K > 1 else taps[0]
            acc = jnp.dot(cat, w_ref[...], preferred_element_type=jnp.float32)
        else:
            # Wide-channel regime: skip the (R, K*cpad) temporary, issue K
            # accumulating dots (each already saturates the MXU depth).
            acc = jnp.dot(taps[0], w_ref[0:cpad, :],
                          preferred_element_type=jnp.float32)
            for k in range(1, K):
                acc = acc + jnp.dot(taps[k], w_ref[k * cpad:(k + 1) * cpad, :],
                                    preferred_element_type=jnp.float32)
        return acc + b_ref[...]

    cur = x_ref[...]                      # (R, cpad) f32; padded lanes are 0
    i = 0
    for dilation, ds_mode in layer_meta:
        w1, b1, w2, b2 = wrefs[i], wrefs[i + 1], wrefs[i + 2], wrefs[i + 3]
        i += 4
        if ds_mode == "fused":
            # conv1 and the 1x1 downsample share one 2*cpad-wide-N MXU dot.
            both = causal_conv(cur, w1, b1, dilation)     # (R, 2*cpad)
            h = jnp.maximum(both[:, :cpad], 0.0)
            res = both[:, cpad:]
        else:
            h = jnp.maximum(causal_conv(cur, w1, b1, dilation), 0.0)
            if ds_mode == "separate":
                wd, bd = wrefs[i], wrefs[i + 1]
                i += 2
                res = jnp.dot(cur.astype(jnp.bfloat16), wd[...],
                              preferred_element_type=jnp.float32) + bd[...]
            else:
                res = cur
        # TODO(synk): nn.Dropout (training mode) omitted -- inference identity.
        h = jnp.maximum(causal_conv(h, w2, b2, dilation), 0.0)
        cur = jnp.maximum(h + res, 0.0)

    # Narrow writeback: only the lanes of the last layer (still 128-aligned).
    out_ref[...] = cur[:, :c_out_pad].astype(out_ref.dtype)


# --------------------------------------------------------------------------
# Weight packing
# --------------------------------------------------------------------------
def _pack_conv_weight(w_oik, cpad, wd_oik=None):
    """PyTorch Conv1d weight (Cout, Cin, K) -> (K*cpad, cpad) bf16.

    Tap block k (rows [k*cpad, (k+1)*cpad)) multiplies x[t - k*dilation],
    which corresponds to PyTorch tap index K-1-k (causal conv + chomp).
    If wd_oik is given, the 1x1 downsample is fused as an extra cpad block
    of output columns, nonzero only in the tap-0 rows."""
    cout, cin, K = w_oik.shape
    w = jnp.transpose(w_oik, (2, 1, 0))[::-1]            # (K, Cin, Cout)
    w = jnp.pad(w, ((0, 0), (0, cpad - cin), (0, cpad - cout)))
    w = w.reshape(K * cpad, cpad)
    if wd_oik is not None:
        cout_d, cin_d, _ = wd_oik.shape
        wd = jnp.transpose(wd_oik[:, :, 0], (1, 0))      # (Cin, Cout)
        wd = jnp.pad(wd, ((0, cpad - cin_d), (0, cpad - cout_d)))
        wd_full = jnp.zeros((K * cpad, cpad), wd.dtype).at[:cpad, :].set(wd)
        w = jnp.concatenate([w, wd_full], axis=1)        # (K*cpad, 2*cpad)
    return w.astype(jnp.bfloat16)


def _pack_down_weight(wd_oik, cpad):
    cout, cin, _ = wd_oik.shape
    w = jnp.transpose(wd_oik[:, :, 0], (1, 0))           # (Cin, Cout)
    w = jnp.pad(w, ((0, cpad - cin), (0, cpad - cout)))
    return w.astype(jnp.bfloat16)


def _pack_bias(b, cpad):
    return jnp.pad(b, (0, cpad - b.shape[0])).reshape(1, cpad).astype(jnp.float32)


# --------------------------------------------------------------------------
# Tiling / VMEM budgeting
# --------------------------------------------------------------------------
def _pick_batch_tile(B, L):
    """Rows per grid step bounded (~<=1024), >=2 grid points when B*L >= 512,
    and rt a multiple of 8 (sublane constraint).  bt need not divide B; the
    wrapper zero-pads the batch."""
    max_rows = 1024
    bt = max(1, min(B, max_rows // max(L, 1)))
    if bt >= B and B > 1 and B * L >= 512:
        bt = (B + 1) // 2           # keep >=2 parallel grid points (megacore)
    while (bt * L) % 8 != 0:
        bt += 1
    return bt


def _vmem_cap_bytes():
    try:
        cap = getattr(pltpu.get_tpu_info(), "vmem_capacity_bytes", None)
        if cap:
            return int(cap)
    except Exception:
        pass
    return 64 * 1024 * 1024         # conservative (v7x-sized) fallback


def _vmem_limit_bytes(weight_bytes, rt, cpad, c_out_pad, K):
    io = 2 * rt * cpad * 4 + 2 * rt * c_out_pad * 4       # double-buffered I/O
    act = 4 * rt * cpad * 4                               # f32 live activations
    taps = K * rt * cpad * 2                              # bf16 taps
    need = weight_bytes + io + act + taps
    cap = _vmem_cap_bytes()
    return int(min(cap * 3 // 4, max(32 * 1024 * 1024, 2 * need)))


# --------------------------------------------------------------------------
# Wrapper: packing, tiling, pallas_call
# --------------------------------------------------------------------------
def tcn_forward_pallas(x_ncl, params, kernel_size):
    """x_ncl: (B, C, L) float32 (PyTorch NCL).  Returns (B, C_last, L) f32."""
    B, c_in, L = x_ncl.shape
    c_last = params[-1]["w1_oik"].shape[0]
    cpad = _round_up(max([c_in] + [p["w1_oik"].shape[0] for p in params]), 128)
    c_out_pad = _round_up(c_last, 128)
    K = kernel_size
    concat_taps = (K * cpad) <= 256

    # (B, C, L) -> lane-dense (rows, cpad); XLA fuses transpose+pad into one pass.
    x = jnp.transpose(x_ncl, (0, 2, 1)).astype(jnp.float32)
    x = jnp.pad(x, ((0, 0), (0, 0), (0, cpad - c_in)))

    bt = _pick_batch_tile(B, L)
    b_pad = _round_up(B, bt)
    if b_pad != B:
        x = jnp.pad(x, ((0, b_pad - B), (0, 0), (0, 0)))
    x = x.reshape(b_pad * L, cpad)
    rt = bt * L
    grid = (b_pad // bt,)

    row_spec = pl.BlockSpec((rt, cpad), lambda i: (i, 0))
    out_spec = pl.BlockSpec((rt, c_out_pad), lambda i: (i, 0))

    args, wshapes, layer_meta = [x], [], []
    for p in params:
        has_ds = p["wd_oik"] is not None
        fuse_ds = has_ds and concat_taps
        w1 = _pack_conv_weight(p["w1_oik"], cpad,
                               wd_oik=p["wd_oik"] if fuse_ds else None)
        if fuse_ds:
            b1 = jnp.concatenate([_pack_bias(p["b1"], cpad),
                                  _pack_bias(p["bd"], cpad)], axis=1)
        else:
            b1 = _pack_bias(p["b1"], cpad)
        w2 = _pack_conv_weight(p["w2_oik"], cpad)
        b2 = _pack_bias(p["b2"], cpad)
        args += [w1, b1, w2, b2]
        wshapes += [w1.shape, b1.shape, w2.shape, b2.shape]
        if has_ds and not fuse_ds:
            wd = _pack_down_weight(p["wd_oik"], cpad)
            bd = _pack_bias(p["bd"], cpad)
            args += [wd, bd]
            wshapes += [wd.shape, bd.shape]
            ds_mode = "separate"
        else:
            ds_mode = "fused" if fuse_ds else "none"
        layer_meta.append((p["dilation"], ds_mode))

    weight_bytes = sum(int(a.size) * a.dtype.itemsize for a in args[1:])
    vmem_limit = _vmem_limit_bytes(weight_bytes, rt, cpad, c_out_pad, K)

    kernel = functools.partial(
        _tcn_stack_kernel, layer_meta=tuple(layer_meta), K=K, L=L, R=rt,
        cpad=cpad, c_out_pad=c_out_pad, concat_taps=concat_taps)

    out_shape = jax.ShapeDtypeStruct((b_pad * L, c_out_pad), jnp.float32)

    def weight_spec(shape, single_buffer):
        if single_buffer:
            # Grid-invariant operand: double-buffering buys nothing and
            # doubles resident weight VMEM.
            return pl.BlockSpec(shape, lambda i: (0, 0),
                                pipeline_mode=pl.Buffered(1))
        return pl.BlockSpec(shape, lambda i: (0, 0))

    def call(single_buffer_weights):
        in_specs = [row_spec] + [weight_spec(s, single_buffer_weights)
                                 for s in wshapes]
        return pl.pallas_call(
            kernel,
            out_shape=out_shape,
            grid_spec=pltpu.PrefetchScalarGridSpec(
                num_scalar_prefetch=0,
                grid=grid,
                in_specs=in_specs,
                out_specs=out_spec,
            ),
            compiler_params=pltpu.CompilerParams(
                dimension_semantics=("parallel",),
                vmem_limit_bytes=vmem_limit),
        )(*args)

    try:
        out = call(True)          # single-buffered grid-invariant weights
    except Exception:
        out = call(False)         # fallback: default double-buffering

    out = out.reshape(b_pad, L, c_out_pad)[:B, :, :c_last]
    return jnp.transpose(out, (0, 2, 1))                 # -> (B, C_last, L)


# --------------------------------------------------------------------------
# Parameter setup (deterministic, mirrors TemporalConvNet.__init__ shapes)
# --------------------------------------------------------------------------
def init_tcn_params(key, num_inputs, num_channels, kernel_size,
                    dilation_factor=2):
    params = []
    cin = num_inputs
    for i, cout in enumerate(num_channels):
        d = dilation_factor ** i
        key, k1, k2, k3, k4, k5, k6 = jax.random.split(key, 7)
        p = dict(
            dilation=d,
            # PyTorch Conv1d weight layout: (Cout, Cin, K); init N(0, 0.01)
            w1_oik=0.01 * jax.random.normal(k1, (cout, cin, kernel_size), jnp.float32),
            b1=0.1 * jax.random.normal(k2, (cout,), jnp.float32),
            w2_oik=0.01 * jax.random.normal(k3, (cout, cout, kernel_size), jnp.float32),
            b2=0.1 * jax.random.normal(k4, (cout,), jnp.float32),
        )
        if cin != cout:
            p["wd_oik"] = 0.01 * jax.random.normal(k5, (cout, cin, 1), jnp.float32)
            p["bd"] = 0.1 * jax.random.normal(k6, (cout,), jnp.float32)
        else:
            p["wd_oik"], p["bd"] = None, None
        params.append(p)
        cin = cout
    return params


# --------------------------------------------------------------------------
# Pure-JAX reference (lax.conv), for correctness check only
# --------------------------------------------------------------------------
def tcn_forward_ref(x_ncl, params, kernel_size):
    out = x_ncl
    for p in params:
        d = p["dilation"]
        pad = (kernel_size - 1) * d

        def causal_conv(inp, w, b, dil, pd):
            y = jax.lax.conv_general_dilated(
                inp, w, window_strides=(1,), padding=[(pd, pd)],
                rhs_dilation=(dil,), dimension_numbers=("NCH", "OIH", "NCH"),
                precision=jax.lax.Precision.HIGHEST)
            if pd > 0:
                y = y[:, :, :y.shape[2] - pd]                       # Chomp1d
            return y + b[None, :, None]

        h = jnp.maximum(causal_conv(out, p["w1_oik"], p["b1"], d, pad), 0.0)
        h = jnp.maximum(causal_conv(h, p["w2_oik"], p["b2"], d, pad), 0.0)
        if p["wd_oik"] is not None:
            res = jax.lax.conv_general_dilated(
                out, p["wd_oik"], (1,), [(0, 0)],
                dimension_numbers=("NCH", "OIH", "NCH"),
                precision=jax.lax.Precision.HIGHEST) + p["bd"][None, :, None]
        else:
            res = out
        out = jnp.maximum(h + res, 0.0)
    return out


if __name__ == "__main__":
    key = jax.random.PRNGKey(0)
    B, C_in, L = 2, 4, 16
    num_channels = (8, 8)         # two TemporalBlocks, dilations 1 and 2
    kernel_size = 2

    key, kx, kp = jax.random.split(key, 3)
    x = jax.random.normal(kx, (B, C_in, L), jnp.float32)            # PyTorch NCL
    params = init_tcn_params(kp, C_in, num_channels, kernel_size)

    out = tcn_forward_pallas(x, params, kernel_size)
    out = jax.block_until_ready(out)

    ref = tcn_forward_ref(x, params, kernel_size)
    assert out.shape == (B, num_channels[-1], L), out.shape
    # bf16 MXU inputs with f32 accumulation -> loosened tolerance vs f32 ref.
    assert jnp.allclose(out, ref, atol=1e-2, rtol=1e-2), \
        float(jnp.max(jnp.abs(out - ref)))

    print("KERNEL_OK")
</pallas_src>

<mosaic_0001>
module attributes {stable_mosaic.version = 11 : i64} {
  func.func @_tcn_stack_kernel(%arg0: i32, %arg1: memref<32x128xf32, #tpu.memory_space<vmem>>, %arg2: memref<256x256xbf16, #tpu.memory_space<vmem>>, %arg3: memref<1x256xf32, #tpu.memory_space<vmem>>, %arg4: memref<256x128xbf16, #tpu.memory_space<vmem>>, %arg5: memref<1x128xf32, #tpu.memory_space<vmem>>, %arg6: memref<256x128xbf16, #tpu.memory_space<vmem>>, %arg7: memref<1x128xf32, #tpu.memory_space<vmem>>, %arg8: memref<256x128xbf16, #tpu.memory_space<vmem>>, %arg9: memref<1x128xf32, #tpu.memory_space<vmem>>, %arg10: memref<32x128xf32, #tpu.memory_space<vmem>>) attributes {dimension_semantics = [#tpu.dimension_semantics<parallel>], iteration_bounds = array<i64: 1>, scalar_prefetch = 0 : i64, scratch_operands = 0 : i64, tpu.core_type = #tpu.core_type<tc>, window_params = [{transform_indices = @transform_0, window_bounds = array<i64: 32, 128>}, {pipeline_mode = #tpu.pipeline_mode<synchronous>, transform_indices = @transform_1, window_bounds = array<i64: 256, 256>}, {pipeline_mode = #tpu.pipeline_mode<synchronous>, transform_indices = @transform_2, window_bounds = array<i64: 1, 256>}, {pipeline_mode = #tpu.pipeline_mode<synchronous>, transform_indices = @transform_3, window_bounds = array<i64: 256, 128>}, {pipeline_mode = #tpu.pipeline_mode<synchronous>, transform_indices = @transform_4, window_bounds = array<i64: 1, 128>}, {pipeline_mode = #tpu.pipeline_mode<synchronous>, transform_indices = @transform_5, window_bounds = array<i64: 256, 128>}, {pipeline_mode = #tpu.pipeline_mode<synchronous>, transform_indices = @transform_6, window_bounds = array<i64: 1, 128>}, {pipeline_mode = #tpu.pipeline_mode<synchronous>, transform_indices = @transform_7, window_bounds = array<i64: 256, 128>}, {pipeline_mode = #tpu.pipeline_mode<synchronous>, transform_indices = @transform_8, window_bounds = array<i64: 1, 128>}, {transform_indices = @transform_9, window_bounds = array<i64: 32, 128>}]} {
    %0 = tpu.iota {dimensions = array<i32: 0>} : vector<32x1xi32>
    %c16_i32 = arith.constant 16 : i32
    %c0_i32 = arith.constant 0 : i32
    %1 = arith.cmpi eq, %c16_i32, %c0_i32 : i32
    %c1_i32 = arith.constant 1 : i32
    %2 = arith.select %1, %c1_i32, %c16_i32 : i32
    %3 = vector.broadcast %2 : i32 to vector<32x1xi32>
    %4 = arith.remsi %0, %3 : vector<32x1xi32>
    %c0_i32_0 = arith.constant 0 : i32
    %5 = vector.broadcast %c0_i32_0 : i32 to vector<32x1xi32>
    %6 = arith.cmpi ne, %4, %5 : vector<32x1xi32>
    %c0_i32_1 = arith.constant 0 : i32
    %7 = vector.broadcast %c0_i32_1 : i32 to vector<32x1xi32>
    %8 = arith.cmpi slt, %4, %7 : vector<32x1xi32>
    %c0_i32_2 = arith.constant 0 : i32
    %9 = arith.cmpi slt, %2, %c0_i32_2 : i32
    %10 = vector.broadcast %9 : i1 to vector<32x1xi1>
    %11 = vector.broadcast %10 : vector<32x1xi1> to vector<32x1xi1>
    %12 = arith.xori %8, %11 : vector<32x1xi1>
    %13 = arith.andi %12, %6 : vector<32x1xi1>
    %14 = vector.broadcast %2 : i32 to vector<32x1xi32>
    %15 = arith.addi %4, %14 : vector<32x1xi32>
    %16 = arith.select %13, %15, %4 : vector<32x1xi1>, vector<32x1xi32>
    %c1_i32_3 = arith.constant 1 : i32
    %17 = vector.broadcast %c1_i32_3 : i32 to vector<32x1xi32>
    %18 = arith.cmpi sge, %16, %17 : vector<32x1xi32>
    %c2_i32 = arith.constant 2 : i32
    %19 = vector.broadcast %c2_i32 : i32 to vector<32x1xi32>
    %20 = arith.cmpi sge, %16, %19 : vector<32x1xi32>
    %c0 = arith.constant 0 : index
    %c0_4 = arith.constant 0 : index
    %21 = vector.load %arg1[%c0, %c0_4] : memref<32x128xf32, #tpu.memory_space<vmem>>, vector<32x128xf32>
    %22 = arith.truncf %21 : vector<32x128xf32> to vector<32x128xbf16>
    %c1_i32_5 = arith.constant 1 : i32
    %23 = tpu.dynamic_rotate %21 by %c1_i32_5 dim 0 : vector<32x128xf32>, i32 -> vector<32x128xf32>
    %cst = arith.constant 0.000000e+00 : f32
    %24 = vector.shape_cast %18 : vector<32x1xi1> to vector<32x1xi1>
    %25 = vector.broadcast %24 : vector<32x1xi1> to vector<32x128xi1>
    %26 = vector.broadcast %cst : f32 to vector<32x128xf32>
    %27 = arith.select %25, %23, %26 : vector<32x128xi1>, vector<32x128xf32>
    %28 = arith.truncf %27 : vector<32x128xf32> to vector<32x128xbf16>
    %29 = tpu.concatenate %22, %28 in 1 : vector<32x128xbf16>, vector<32x128xbf16> -> vector<32x256xbf16>
    %c0_6 = arith.constant 0 : index
    %c0_7 = arith.constant 0 : index
    %30 = vector.load %arg2[%c0_6, %c0_7] : memref<256x256xbf16, #tpu.memory_space<vmem>>, vector<256x256xbf16>
    %cst_8 = arith.constant dense<0.000000e+00> : vector<32x256xf32>
    %31 = tpu.matmul %29, %30, %cst_8 {dimension_numbers = #tpu.dot_dimension_numbers<[1], [0], [0], [1], [0, 0, 1, 1], [], []>} : vector<32x256xbf16>, vector<256x256xbf16>, vector<32x256xf32> -> vector<32x256xf32>
    %c0_9 = arith.constant 0 : index
    %c0_10 = arith.constant 0 : index
    %32 = vector.load %arg3[%c0_9, %c0_10] : memref<1x256xf32, #tpu.memory_space<vmem>>, vector<1x256xf32>
    %33 = vector.broadcast %32 : vector<1x256xf32> to vector<32x256xf32>
    %34 = arith.addf %31, %33 : vector<32x256xf32>
    %35 = vector.extract_strided_slice %34 {offsets = [0, 0], sizes = [32, 128], strides = [1, 1]} : vector<32x256xf32> to vector<32x128xf32>
    %cst_11 = arith.constant 0.000000e+00 : f32
    %36 = vector.broadcast %cst_11 : f32 to vector<32x128xf32>
    %37 = arith.maximumf %35, %36 : vector<32x128xf32>
    %38 = vector.extract_strided_slice %34 {offsets = [0, 128], sizes = [32, 128], strides = [1, 1]} : vector<32x256xf32> to vector<32x128xf32>
    %39 = arith.truncf %37 : vector<32x128xf32> to vector<32x128xbf16>
    %c1_i32_12 = arith.constant 1 : i32
    %40 = tpu.dynamic_rotate %37 by %c1_i32_12 dim 0 : vector<32x128xf32>, i32 -> vector<32x128xf32>
    %cst_13 = arith.constant 0.000000e+00 : f32
    %41 = vector.shape_cast %18 : vector<32x1xi1> to vector<32x1xi1>
    %42 = vector.broadcast %41 : vector<32x1xi1> to vector<32x128xi1>
    %43 = vector.broadcast %cst_13 : f32 to vector<32x128xf32>
    %44 = arith.select %42, %40, %43 : vector<32x128xi1>, vector<32x128xf32>
    %45 = arith.truncf %44 : vector<32x128xf32> to vector<32x128xbf16>
    %46 = tpu.concatenate %39, %45 in 1 : vector<32x128xbf16>, vector<32x128xbf16> -> vector<32x256xbf16>
    %c0_14 = arith.constant 0 : index
    %c0_15 = arith.constant 0 : index
    %47 = vector.load %arg4[%c0_14, %c0_15] : memref<256x128xbf16, #tpu.memory_space<vmem>>, vector<256x128xbf16>
    %cst_16 = arith.constant dense<0.000000e+00> : vector<32x128xf32>
    %48 = tpu.matmul %46, %47, %cst_16 {dimension_numbers = #tpu.dot_dimension_numbers<[1], [0], [0], [1], [0, 0, 1, 1], [], []>} : vector<32x256xbf16>, vector<256x128xbf16>, vector<32x128xf32> -> vector<32x128xf32>
    %c0_17 = arith.constant 0 : index
    %c0_18 = arith.constant 0 : index
    %49 = vector.load %arg5[%c0_17, %c0_18] : memref<1x128xf32, #tpu.memory_space<vmem>>, vector<1x128xf32>
    %50 = vector.broadcast %49 : vector<1x128xf32> to vector<32x128xf32>
    %51 = arith.addf %48, %50 : vector<32x128xf32>
    %cst_19 = arith.constant 0.000000e+00 : f32
    %52 = vector.broadcast %cst_19 : f32 to vector<32x128xf32>
    %53 = arith.maximumf %51, %52 : vector<32x128xf32>
    %54 = arith.addf %53, %38 : vector<32x128xf32>
    %cst_20 = arith.constant 0.000000e+00 : f32
    %55 = vector.broadcast %cst_20 : f32 to vector<32x128xf32>
    %56 = arith.maximumf %54, %55 : vector<32x128xf32>
    %57 = arith.truncf %56 : vector<32x128xf32> to vector<32x128xbf16>
    %c2_i32_21 = arith.constant 2 : i32
    %58 = tpu.dynamic_rotate %56 by %c2_i32_21 dim 0 : vector<32x128xf32>, i32 -> vector<32x128xf32>
    %cst_22 = arith.constant 0.000000e+00 : f32
    %59 = vector.shape_cast %20 : vector<32x1xi1> to vector<32x1xi1>
    %60 = vector.broadcast %59 : vector<32x1xi1> to vector<32x128xi1>
    %61 = vector.broadcast %cst_22 : f32 to vector<32x128xf32>
    %62 = arith.select %60, %58, %61 : vector<32x128xi1>, vector<32x128xf32>
    %63 = arith.truncf %62 : vector<32x128xf32> to vector<32x128xbf16>
    %64 = tpu.concatenate %57, %63 in 1 : vector<32x128xbf16>, vector<32x128xbf16> -> vector<32x256xbf16>
    %c0_23 = arith.constant 0 : index
    %c0_24 = arith.constant 0 : index
    %65 = vector.load %arg6[%c0_23, %c0_24] : memref<256x128xbf16, #tpu.memory_space<vmem>>, vector<256x128xbf16>
    %cst_25 = arith.constant dense<0.000000e+00> : vector<32x128xf32>
    %66 = tpu.matmul %64, %65, %cst_25 {dimension_numbers = #tpu.dot_dimension_numbers<[1], [0], [0], [1], [0, 0, 1, 1], [], []>} : vector<32x256xbf16>, vector<256x128xbf16>, vector<32x128xf32> -> vector<32x128xf32>
    %c0_26 = arith.constant 0 : index
    %c0_27 = arith.constant 0 : index
    %67 = vector.load %arg7[%c0_26, %c0_27] : memref<1x128xf32, #tpu.memory_space<vmem>>, vector<1x128xf32>
    %68 = vector.broadcast %67 : vector<1x128xf32> to vector<32x128xf32>
    %69 = arith.addf %66, %68 : vector<32x128xf32>
    %cst_28 = arith.constant 0.000000e+00 : f32
    %70 = vector.broadcast %cst_28 : f32 to vector<32x128xf32>
    %71 = arith.maximumf %69, %70 : vector<32x128xf32>
    %72 = arith.truncf %71 : vector<32x128xf32> to vector<32x128xbf16>
    %c2_i32_29 = arith.constant 2 : i32
    %73 = tpu.dynamic_rotate %71 by %c2_i32_29 dim 0 : vector<32x128xf32>, i32 -> vector<32x128xf32>
    %cst_30 = arith.constant 0.000000e+00 : f32
    %74 = vector.shape_cast %20 : vector<32x1xi1> to vector<32x1xi1>
    %75 = vector.broadcast %74 : vector<32x1xi1> to vector<32x128xi1>
    %76 = vector.broadcast %cst_30 : f32 to vector<32x128xf32>
    %77 = arith.select %75, %73, %76 : vector<32x128xi1>, vector<32x128xf32>
    %78 = arith.truncf %77 : vector<32x128xf32> to vector<32x128xbf16>
    %79 = tpu.concatenate %72, %78 in 1 : vector<32x128xbf16>, vector<32x128xbf16> -> vector<32x256xbf16>
    %c0_31 = arith.constant 0 : index
    %c0_32 = arith.constant 0 : index
    %80 = vector.load %arg8[%c0_31, %c0_32] : memref<256x128xbf16, #tpu.memory_space<vmem>>, vector<256x128xbf16>
    %cst_33 = arith.constant dense<0.000000e+00> : vector<32x128xf32>
    %81 = tpu.matmul %79, %80, %cst_33 {dimension_numbers = #tpu.dot_dimension_numbers<[1], [0], [0], [1], [0, 0, 1, 1], [], []>} : vector<32x256xbf16>, vector<256x128xbf16>, vector<32x128xf32> -> vector<32x128xf32>
    %c0_34 = arith.constant 0 : index
    %c0_35 = arith.constant 0 : index
    %82 = vector.load %arg9[%c0_34, %c0_35] : memref<1x128xf32, #tpu.memory_space<vmem>>, vector<1x128xf32>
    %83 = vector.broadcast %82 : vector<1x128xf32> to vector<32x128xf32>
    %84 = arith.addf %81, %83 : vector<32x128xf32>
    %cst_36 = arith.constant 0.000000e+00 : f32
    %85 = vector.broadcast %cst_36 : f32 to vector<32x128xf32>
    %86 = arith.maximumf %84, %85 : vector<32x128xf32>
    %87 = arith.addf %86, %56 : vector<32x128xf32>
    %cst_37 = arith.constant 0.000000e+00 : f32
    %88 = vector.broadcast %cst_37 : f32 to vector<32x128xf32>
    %89 = arith.maximumf %87, %88 : vector<32x128xf32>
    %c0_38 = arith.constant 0 : index
    %c0_39 = arith.constant 0 : index
    %90 = vector.load %arg10[%c0_38, %c0_39] : memref<32x128xf32, #tpu.memory_space<vmem>>, vector<32x128xf32>
    tpu.vector_store %arg10[%c0_38, %c0_39], %89 {strides = array<i32>} : memref<32x128xf32, #tpu.memory_space<vmem>>, vector<32x128xf32>,
    return
  }
  func.func @transform_0(%arg0: i32) -> (i32, i32) {
    %c0_i32 = arith.constant 0 : i32
    %c0_i32_0 = arith.constant 0 : i32
    return %arg0, %c0_i32 : i32, i32
  }
  func.func @transform_1(%arg0: i32) -> (i32, i32) {
    %c0_i32 = arith.constant 0 : i32
    %c0_i32_0 = arith.constant 0 : i32
    %c0_i32_1 = arith.constant 0 : i32
    return %c0_i32, %c0_i32_0 : i32, i32
  }
  func.func @transform_2(%arg0: i32) -> (i32, i32) {
    %c0_i32 = arith.constant 0 : i32
    %c0_i32_0 = arith.constant 0 : i32
    %c0_i32_1 = arith.constant 0 : i32
    return %c0_i32, %c0_i32_0 : i32, i32
  }
  func.func @transform_3(%arg0: i32) -> (i32, i32) {
    %c0_i32 = arith.constant 0 : i32
    %c0_i32_0 = arith.constant 0 : i32
    %c0_i32_1 = arith.constant 0 : i32
    return %c0_i32, %c0_i32_0 : i32, i32
  }
  func.func @transform_4(%arg0: i32) -> (i32, i32) {
    %c0_i32 = arith.constant 0 : i32
    %c0_i32_0 = arith.constant 0 : i32
    %c0_i32_1 = arith.constant 0 : i32
    return %c0_i32, %c0_i32_0 : i32, i32
  }
  func.func @transform_5(%arg0: i32) -> (i32, i32) {
    %c0_i32 = arith.constant 0 : i32
    %c0_i32_0 = arith.constant 0 : i32
    %c0_i32_1 = arith.constant 0 : i32
    return %c0_i32, %c0_i32_0 : i32, i32
  }
  func.func @transform_6(%arg0: i32) -> (i32, i32) {
    %c0_i32 = arith.constant 0 : i32
    %c0_i32_0 = arith.constant 0 : i32
    %c0_i32_1 = arith.constant 0 : i32
    return %c0_i32, %c0_i32_0 : i32, i32
  }
  func.func @transform_7(%arg0: i32) -> (i32, i32) {
    %c0_i32 = arith.constant 0 : i32
    %c0_i32_0 = arith.constant 0 : i32
    %c0_i32_1 = arith.constant 0 : i32
    return %c0_i32, %c0_i32_0 : i32, i32
  }
  func.func @transform_8(%arg0: i32) -> (i32, i32) {
    %c0_i32 = arith.constant 0 : i32
    %c0_i32_0 = arith.constant 0 : i32
    %c0_i32_1 = arith.constant 0 : i32
    return %c0_i32, %c0_i32_0 : i32, i32
  }
  func.func @transform_9(%arg0: i32) -> (i32, i32) {
    %c0_i32 = arith.constant 0 : i32
    %c0_i32_0 = arith.constant 0 : i32
    return %arg0, %c0_i32 : i32, i32
  }
}

module attributes {stable_mosaic.version = 11 : i64} {
  func.func @_tcn_stack_kernel(%arg0: i32, %arg1: memref<32x128xf32, #tpu.memory_space<vmem>>, %arg2: memref<256x256xbf16, #tpu.memory_space<vmem>>, %arg3: memref<1x256xf32, #tpu.memory_space<vmem>>, %arg4: memref<256x128xbf16, #tpu.memory_space<vmem>>, %arg5: memref<1x128xf32, #tpu.memory_space<vmem>>, %arg6: memref<256x128xbf16, #tpu.memory_space<vmem>>, %arg7: memref<1x128xf32, #tpu.memory_space<vmem>>, %arg8: memref<256x128xbf16, #tpu.memory_space<vmem>>, %arg9: memref<1x128xf32, #tpu.memory_space<vmem>>, %arg10: memref<32x128xf32, #tpu.memory_space<vmem>>) attributes {dimension_semantics = [#tpu.dimension_semantics<parallel>], iteration_bounds = array<i64: 1>, scalar_prefetch = 0 : i64, scratch_operands = 0 : i64, tpu.core_type = #tpu.core_type<tc>, window_params = [{transform_indices = @transform_0, window_bounds = array<i64: 32, 128>}, {pipeline_mode = #tpu.pipeline_mode<synchronous>, transform_indices = @transform_1, window_bounds = array<i64: 256, 256>}, {pipeline_mode = #tpu.pipeline_mode<synchronous>, transform_indices = @transform_2, window_bounds = array<i64: 1, 256>}, {pipeline_mode = #tpu.pipeline_mode<synchronous>, transform_indices = @transform_3, window_bounds = array<i64: 256, 128>}, {pipeline_mode = #tpu.pipeline_mode<synchronous>, transform_indices = @transform_4, window_bounds = array<i64: 1, 128>}, {pipeline_mode = #tpu.pipeline_mode<synchronous>, transform_indices = @transform_5, window_bounds = array<i64: 256, 128>}, {pipeline_mode = #tpu.pipeline_mode<synchronous>, transform_indices = @transform_6, window_bounds = array<i64: 1, 128>}, {pipeline_mode = #tpu.pipeline_mode<synchronous>, transform_indices = @transform_7, window_bounds = array<i64: 256, 128>}, {pipeline_mode = #tpu.pipeline_mode<synchronous>, transform_indices = @transform_8, window_bounds = array<i64: 1, 128>}, {transform_indices = @transform_9, window_bounds = array<i64: 32, 128>}]} {
    %0 = tpu.iota {dimensions = array<i32: 0>} : vector<32x1xi32>
    %c16_i32 = arith.constant 16 : i32
    %c0_i32 = arith.constant 0 : i32
    %1 = arith.cmpi eq, %c16_i32, %c0_i32 : i32
    %c1_i32 = arith.constant 1 : i32
    %2 = arith.select %1, %c1_i32, %c16_i32 : i32
    %3 = vector.broadcast %2 : i32 to vector<32x1xi32>
    %4 = arith.remsi %0, %3 : vector<32x1xi32>
    %c0_i32_0 = arith.constant 0 : i32
    %5 = vector.broadcast %c0_i32_0 : i32 to vector<32x1xi32>
    %6 = arith.cmpi ne, %4, %5 : vector<32x1xi32>
    %c0_i32_1 = arith.constant 0 : i32
    %7 = vector.broadcast %c0_i32_1 : i32 to vector<32x1xi32>
    %8 = arith.cmpi slt, %4, %7 : vector<32x1xi32>
    %c0_i32_2 = arith.constant 0 : i32
    %9 = arith.cmpi slt, %2, %c0_i32_2 : i32
    %10 = vector.broadcast %9 : i1 to vector<32x1xi1>
    %11 = vector.broadcast %10 : vector<32x1xi1> to vector<32x1xi1>
    %12 = arith.xori %8, %11 : vector<32x1xi1>
    %13 = arith.andi %12, %6 : vector<32x1xi1>
    %14 = vector.broadcast %2 : i32 to vector<32x1xi32>
    %15 = arith.addi %4, %14 : vector<32x1xi32>
    %16 = arith.select %13, %15, %4 : vector<32x1xi1>, vector<32x1xi32>
    %c1_i32_3 = arith.constant 1 : i32
    %17 = vector.broadcast %c1_i32_3 : i32 to vector<32x1xi32>
    %18 = arith.cmpi sge, %16, %17 : vector<32x1xi32>
    %c2_i32 = arith.constant 2 : i32
    %19 = vector.broadcast %c2_i32 : i32 to vector<32x1xi32>
    %20 = arith.cmpi sge, %16, %19 : vector<32x1xi32>
    %c0 = arith.constant 0 : index
    %c0_4 = arith.constant 0 : index
    %21 = vector.load %arg1[%c0, %c0_4] : memref<32x128xf32, #tpu.memory_space<vmem>>, vector<32x128xf32>
    %22 = arith.truncf %21 : vector<32x128xf32> to vector<32x128xbf16>
    %c1_i32_5 = arith.constant 1 : i32
    %23 = tpu.dynamic_rotate %21 by %c1_i32_5 dim 0 : vector<32x128xf32>, i32 -> vector<32x128xf32>
    %cst = arith.constant 0.000000e+00 : f32
    %24 = vector.shape_cast %18 : vector<32x1xi1> to vector<32x1xi1>
    %25 = vector.broadcast %24 : vector<32x1xi1> to vector<32x128xi1>
    %26 = vector.broadcast %cst : f32 to vector<32x128xf32>
    %27 = arith.select %25, %23, %26 : vector<32x128xi1>, vector<32x128xf32>
    %28 = arith.truncf %27 : vector<32x128xf32> to vector<32x128xbf16>
    %29 = tpu.concatenate %22, %28 in 1 : vector<32x128xbf16>, vector<32x128xbf16> -> vector<32x256xbf16>
    %c0_6 = arith.constant 0 : index
    %c0_7 = arith.constant 0 : index
    %30 = vector.load %arg2[%c0_6, %c0_7] : memref<256x256xbf16, #tpu.memory_space<vmem>>, vector<256x256xbf16>
    %cst_8 = arith.constant dense<0.000000e+00> : vector<32x256xf32>
    %31 = tpu.matmul %29, %30, %cst_8 {dimension_numbers = #tpu.dot_dimension_numbers<[1], [0], [0], [1], [0, 0, 1, 1], [], []>} : vector<32x256xbf16>, vector<256x256xbf16>, vector<32x256xf32> -> vector<32x256xf32>
    %c0_9 = arith.constant 0 : index
    %c0_10 = arith.constant 0 : index
    %32 = vector.load %arg3[%c0_9, %c0_10] : memref<1x256xf32, #tpu.memory_space<vmem>>, vector<1x256xf32>
    %33 = vector.broadcast %32 : vector<1x256xf32> to vector<32x256xf32>
    %34 = arith.addf %31, %33 : vector<32x256xf32>
    %35 = vector.extract_strided_slice %34 {offsets = [0, 0], sizes = [32, 128], strides = [1, 1]} : vector<32x256xf32> to vector<32x128xf32>
    %cst_11 = arith.constant 0.000000e+00 : f32
    %36 = vector.broadcast %cst_11 : f32 to vector<32x128xf32>
    %37 = arith.maximumf %35, %36 : vector<32x128xf32>
    %38 = vector.extract_strided_slice %34 {offsets = [0, 128], sizes = [32, 128], strides = [1, 1]} : vector<32x256xf32> to vector<32x128xf32>
    %39 = arith.truncf %37 : vector<32x128xf32> to vector<32x128xbf16>
    %c1_i32_12 = arith.constant 1 : i32
    %40 = tpu.dynamic_rotate %37 by %c1_i32_12 dim 0 : vector<32x128xf32>, i32 -> vector<32x128xf32>
    %cst_13 = arith.constant 0.000000e+00 : f32
    %41 = vector.shape_cast %18 : vector<32x1xi1> to vector<32x1xi1>
    %42 = vector.broadcast %41 : vector<32x1xi1> to vector<32x128xi1>
    %43 = vector.broadcast %cst_13 : f32 to vector<32x128xf32>
    %44 = arith.select %42, %40, %43 : vector<32x128xi1>, vector<32x128xf32>
    %45 = arith.truncf %44 : vector<32x128xf32> to vector<32x128xbf16>
    %46 = tpu.concatenate %39, %45 in 1 : vector<32x128xbf16>, vector<32x128xbf16> -> vector<32x256xbf16>
    %c0_14 = arith.constant 0 : index
    %c0_15 = arith.constant 0 : index
    %47 = vector.load %arg4[%c0_14, %c0_15] : memref<256x128xbf16, #tpu.memory_space<vmem>>, vector<256x128xbf16>
    %cst_16 = arith.constant dense<0.000000e+00> : vector<32x128xf32>
    %48 = tpu.matmul %46, %47, %cst_16 {dimension_numbers = #tpu.dot_dimension_numbers<[1], [0], [0], [1], [0, 0, 1, 1], [], []>} : vector<32x256xbf16>, vector<256x128xbf16>, vector<32x128xf32> -> vector<32x128xf32>
    %c0_17 = arith.constant 0 : index
    %c0_18 = arith.constant 0 : index
    %49 = vector.load %arg5[%c0_17, %c0_18] : memref<1x128xf32, #tpu.memory_space<vmem>>, vector<1x128xf32>
    %50 = vector.broadcast %49 : vector<1x128xf32> to vector<32x128xf32>
    %51 = arith.addf %48, %50 : vector<32x128xf32>
    %cst_19 = arith.constant 0.000000e+00 : f32
    %52 = vector.broadcast %cst_19 : f32 to vector<32x128xf32>
    %53 = arith.maximumf %51, %52 : vector<32x128xf32>
    %54 = arith.addf %53, %38 : vector<32x128xf32>
    %cst_20 = arith.constant 0.000000e+00 : f32
    %55 = vector.broadcast %cst_20 : f32 to vector<32x128xf32>
    %56 = arith.maximumf %54, %55 : vector<32x128xf32>
    %57 = arith.truncf %56 : vector<32x128xf32> to vector<32x128xbf16>
    %c2_i32_21 = arith.constant 2 : i32
    %58 = tpu.dynamic_rotate %56 by %c2_i32_21 dim 0 : vector<32x128xf32>, i32 -> vector<32x128xf32>
    %cst_22 = arith.constant 0.000000e+00 : f32
    %59 = vector.shape_cast %20 : vector<32x1xi1> to vector<32x1xi1>
    %60 = vector.broadcast %59 : vector<32x1xi1> to vector<32x128xi1>
    %61 = vector.broadcast %cst_22 : f32 to vector<32x128xf32>
    %62 = arith.select %60, %58, %61 : vector<32x128xi1>, vector<32x128xf32>
    %63 = arith.truncf %62 : vector<32x128xf32> to vector<32x128xbf16>
    %64 = tpu.concatenate %57, %63 in 1 : vector<32x128xbf16>, vector<32x128xbf16> -> vector<32x256xbf16>
    %c0_23 = arith.constant 0 : index
    %c0_24 = arith.constant 0 : index
    %65 = vector.load %arg6[%c0_23, %c0_24] : memref<256x128xbf16, #tpu.memory_space<vmem>>, vector<256x128xbf16>
    %cst_25 = arith.constant dense<0.000000e+00> : vector<32x128xf32>
    %66 = tpu.matmul %64, %65, %cst_25 {dimension_numbers = #tpu.dot_dimension_numbers<[1], [0], [0], [1], [0, 0, 1, 1], [], []>} : vector<32x256xbf16>, vector<256x128xbf16>, vector<32x128xf32> -> vector<32x128xf32>
    %c0_26 = arith.constant 0 : index
    %c0_27 = arith.constant 0 : index
    %67 = vector.load %arg7[%c0_26, %c0_27] : memref<1x128xf32, #tpu.memory_space<vmem>>, vector<1x128xf32>
    %68 = vector.broadcast %67 : vector<1x128xf32> to vector<32x128xf32>
    %69 = arith.addf %66, %68 : vector<32x128xf32>
    %cst_28 = arith.constant 0.000000e+00 : f32
    %70 = vector.broadcast %cst_28 : f32 to vector<32x128xf32>
    %71 = arith.maximumf %69, %70 : vector<32x128xf32>
    %72 = arith.truncf %71 : vector<32x128xf32> to vector<32x128xbf16>
    %c2_i32_29 = arith.constant 2 : i32
    %73 = tpu.dynamic_rotate %71 by %c2_i32_29 dim 0 : vector<32x128xf32>, i32 -> vector<32x128xf32>
    %cst_30 = arith.constant 0.000000e+00 : f32
    %74 = vector.shape_cast %20 : vector<32x1xi1> to vector<32x1xi1>
    %75 = vector.broadcast %74 : vector<32x1xi1> to vector<32x128xi1>
    %76 = vector.broadcast %cst_30 : f32 to vector<32x128xf32>
    %77 = arith.select %75, %73, %76 : vector<32x128xi1>, vector<32x128xf32>
    %78 = arith.truncf %77 : vector<32x128xf32> to vector<32x128xbf16>
    %79 = tpu.concatenate %72, %78 in 1 : vector<32x128xbf16>, vector<32x128xbf16> -> vector<32x256xbf16>
    %c0_31 = arith.constant 0 : index
    %c0_32 = arith.constant 0 : index
    %80 = vector.load %arg8[%c0_31, %c0_32] : memref<256x128xbf16, #tpu.memory_space<vmem>>, vector<256x128xbf16>
    %cst_33 = arith.constant dense<0.000000e+00> : vector<32x128xf32>
    %81 = tpu.matmul %79, %80, %cst_33 {dimension_numbers = #tpu.dot_dimension_numbers<[1], [0], [0], [1], [0, 0, 1, 1], [], []>} : vector<32x256xbf16>, vector<256x128xbf16>, vector<32x128xf32> -> vector<32x128xf32>
    %c0_34 = arith.constant 0 : index
    %c0_35 = arith.constant 0 : index
    %82 = vector.load %arg9[%c0_34, %c0_35] : memref<1x128xf32, #tpu.memory_space<vmem>>, vector<1x128xf32>
    %83 = vector.broadcast %82 : vector<1x128xf32> to vector<32x128xf32>
    %84 = arith.addf %81, %83 : vector<32x128xf32>
    %cst_36 = arith.constant 0.000000e+00 : f32
    %85 = vector.broadcast %cst_36 : f32 to vector<32x128xf32>
    %86 = arith.maximumf %84, %85 : vector<32x128xf32>
    %87 = arith.addf %86, %56 : vector<32x128xf32>
    %cst_37 = arith.constant 0.000000e+00 : f32
    %88 = vector.broadcast %cst_37 : f32 to vector<32x128xf32>
    %89 = arith.maximumf %87, %88 : vector<32x128xf32>
    %c0_38 = arith.constant 0 : index
    %c0_39 = arith.constant 0 : index
    %90 = vector.load %arg10[%c0_38, %c0_39] : memref<32x128xf32, #tpu.memory_space<vmem>>, vector<32x128xf32>
    tpu.vector_store %arg10[%c0_38, %c0_39], %89 {strides = array<i32>} : memref<32x128xf32, #tpu.memory_space<vmem>>, vector<32x128xf32>,
    return
  }
  func.func @transform_0(%arg0: i32) -> (i32, i32) {
    %c0_i32 = arith.constant 0 : i32
    %c0_i32_0 = arith.constant 0 : i32
    return %arg0, %c0_i32 : i32, i32
  }
  func.func @transform_1(%arg0: i32) -> (i32, i32) {
    %c0_i32 = arith.constant 0 : i32
    %c0_i32_0 = arith.constant 0 : i32
    %c0_i32_1 = arith.constant 0 : i32
    return %c0_i32, %c0_i32_0 : i32, i32
  }
  func.func @transform_2(%arg0: i32) -> (i32, i32) {
    %c0_i32 = arith.constant 0 : i32
    %c0_i32_0 = arith.constant 0 : i32
    %c0_i32_1 = arith.constant 0 : i32
    return %c0_i32, %c0_i32_0 : i32, i32
  }
  func.func @transform_3(%arg0: i32) -> (i32, i32) {
    %c0_i32 = arith.constant 0 : i32
    %c0_i32_0 = arith.constant 0 : i32
    %c0_i32_1 = arith.constant 0 : i32
    return %c0_i32, %c0_i32_0 : i32, i32
  }
  func.func @transform_4(%arg0: i32) -> (i32, i32) {
    %c0_i32 = arith.constant 0 : i32
    %c0_i32_0 = arith.constant 0 : i32
    %c0_i32_1 = arith.constant 0 : i32
    return %c0_i32, %c0_i32_0 : i32, i32
  }
  func.func @transform_5(%arg0: i32) -> (i32, i32) {
    %c0_i32 = arith.constant 0 : i32
    %c0_i32_0 = arith.constant 0 : i32
    %c0_i32_1 = arith.constant 0 : i32
    return %c0_i32, %c0_i32_0 : i32, i32
  }
  func.func @transform_6(%arg0: i32) -> (i32, i32) {
    %c0_i32 = arith.constant 0 : i32
    %c0_i32_0 = arith.constant 0 : i32
    %c0_i32_1 = arith.constant 0 : i32
    return %c0_i32, %c0_i32_0 : i32, i32
  }
  func.func @transform_7(%arg0: i32) -> (i32, i32) {
    %c0_i32 = arith.constant 0 : i32
    %c0_i32_0 = arith.constant 0 : i32
    %c0_i32_1 = arith.constant 0 : i32
    return %c0_i32, %c0_i32_0 : i32, i32
  }
  func.func @transform_8(%arg0: i32) -> (i32, i32) {
    %c0_i32 = arith.constant 0 : i32
    %c0_i32_0 = arith.constant 0 : i32
    %c0_i32_1 = arith.constant 0 : i32
    return %c0_i32, %c0_i32_0 : i32, i32
  }
  func.func @transform_9(%arg0: i32) -> (i32, i32) {
    %c0_i32 = arith.constant 0 : i32
    %c0_i32_0 = arith.constant 0 : i32
    return %arg0, %c0_i32 : i32, i32
  }
}

</mosaic_0001>

<bundles_post_ra>
// kernel: tpu_custom_call.1
= control target key start
LH: loop header
LB: loop body
LE: loop exit
PB: predicated region body
PF: predicated region fallthrough
CT: control target
= control target key end

     0   :  { %14 = vsyncpa [#allocation3], 0  ;;  %s1800_s0 = inlined_call_operand.hbm [shape: f32[32,128], index: 0, kind: input, shape index: {}]   ;;  %s1801_s1 = inlined_call_operand.hbm [shape: bf16[256,256], index: 1, kind: input, shape index: {}]   ;;  %s1802_s2 = inlined_call_operand.vmem [shape: f32[1,256], index: 2, kind: input, shape index: {}]   ;;  %s1803_s3 = inlined_call_operand.hbm [shape: bf16[256,128], index: 3, kind: input, shape index: {}]   ;;  %s1804_s4 = inlined_call_operand.vmem [shape: f32[1,128], index: 4, kind: input, shape index: {}]   ;;  %s1805_s5 = inlined_call_operand.hbm [shape: bf16[256,128], index: 5, kind: input, shape index: {}]   ;;  %s1806_s6 = inlined_call_operand.vmem [shape: f32[1,128], index: 6, kind: input, shape index: {}]   ;;  %s1807_s7 = inlined_call_operand.hbm [shape: bf16[256,128], index: 7, kind: input, shape index: {}]   ;;  %s1808_s8 = inlined_call_operand.vmem [shape: f32[1,128], index: 8, kind: input, shape index: {}]   ;;  %s1809_s9 = inlined_call_operand.hbm [shape: f32[32,128], index: 9, kind: output, shape index: {}]  }
   0x1   :  { %15 = vsyncpa [#allocation6], 0 }
   0x2   :  { %16 = vsyncpa [#allocation9], 0 }
   0x3   :  { %17 = vsyncpa [#allocation4], 0  ;;  %s1555_s30 = smov [#allocation5]  }
   0x4   :  { %s35_s10 = sshll.u32 %s1555_s30, 4  ;;  %s36_s10 = int_to_ptr.vmem [resolvable:$true] %s35_s10 }
   0x5   :  { %s1435_s11 = scalar_lea.vmem %s36_s10, 4096  ;;  %p1440_p1 = scmp.lt.s32.totalorder %s36_s10, %s36_s10 }
   0x6   :  { %p1436_p0 = scmp.ne.s32.totalorder %s36_s10, %s1435_s11  ;;  %p1441_p2 = scmp.lt.s32.totalorder %s1435_s11, %s1435_s11 }
   0x8   :  { %p1442_p3 = por %p1441_p2, %p1440_p1 }
   0xa   :  { %p1443_p4 = pnand %p1442_p3, %p1436_p0 }
   0xc   :  { %1446 = shalt.err (!%p1443_p4)
}
   0xd   :  { %s1556_s12 = smov 128   ;;  %s1557_s13 = smov 8  }
   0xe   :  { %41 = dma.hbm_to_vmem [thread:$0]  %s1801_s1, 4096, %s36_s10, [#allocation6], %s1556_s12, %s1556_s12, %s1557_s13  }
   0xf   :  { %s1558_s16 = smov [#allocation8]   ;;  %s1559_s18 = smov [#allocation2]  }
  0x10   :  { %s63_s17 = sshll.u32 %s1558_s16, 4  ;;  %s23_s19 = sshll.u32 %s1559_s18, 4  ;;  %s64_s17 = int_to_ptr.vmem [resolvable:$true] %s63_s17  ;;  %s24_s19 = int_to_ptr.vmem [resolvable:$true] %s23_s19 }
  0x11   :  { %s1455_s20 = scalar_lea.vmem %s64_s17, 2048  ;;  %p1460_p6 = scmp.lt.s32.totalorder %s64_s17, %s64_s17 }
  0x12   :  { %p1456_p5 = scmp.ne.s32.totalorder %s64_s17, %s1455_s20  ;;  %p1461_p7 = scmp.lt.s32.totalorder %s1455_s20, %s1455_s20 }
  0x14   :  { %p1462_p8 = por %p1461_p7, %p1460_p6 }
  0x16   :  { %p1463_p9 = pnand %p1462_p8, %p1456_p5 }
  0x18   :  { %1466 = shalt.err (!%p1463_p9)
}
  0x19   :  { %s1560_s21 = smov 64   ;;  %s1561_s22 = smov 4  }
  0x1a   :  { %69 = dma.hbm_to_vmem [thread:$0]  %s1805_s5, 2048, %s64_s17, [#allocation9], %s1560_s21, %s1560_s21, %s1561_s22  }
  0x1b   :  { %s1475_s1 = scalar_lea.vmem %s24_s19, 512  ;;  %p1480_p11 = scmp.lt.s32.totalorder %s24_s19, %s24_s19 }
  0x1c   :  { %p1476_p10 = scmp.ne.s32.totalorder %s24_s19, %s1475_s1  ;;  %p1481_p12 = scmp.lt.s32.totalorder %s1475_s1, %s1475_s1 }
  0x1e   :  { %p1482_p13 = por %p1481_p12, %p1480_p11 }
  0x20   :  { %p1483_p0 = pnand %p1482_p13, %p1476_p10 }
  0x22   :  { %1486 = shalt.err (!%p1483_p0)
}
  0x23   :  { %29 = dma.hbm_to_vmem [thread:$0]  %s1800_s0, 512, %s24_s19, [#allocation3], %s1556_s12, %s1556_s12, %s1557_s13  }
  0x24   :  { %s1562_s27 = smov [#allocation7]   ;;  %s1563_s29 = smov [#allocation10]  }
  0x25   :  { %s49_s28 = sshll.u32 %s1562_s27, 4  ;;  %s77_s5 = sshll.u32 %s1563_s29, 4  ;;  %s50_s28 = int_to_ptr.vmem [resolvable:$true] %s49_s28  ;;  %s78_s5 = int_to_ptr.vmem [resolvable:$true] %s77_s5 }
  0x26   :  { %s1495_s30 = scalar_lea.vmem %s50_s28, 2048  ;;  %p1500_p2 = scmp.lt.s32.totalorder %s50_s28, %s50_s28 }
  0x27   :  { %p1496_p1 = scmp.ne.s32.totalorder %s50_s28, %s1495_s30  ;;  %p1501_p3 = scmp.lt.s32.totalorder %s1495_s30, %s1495_s30 }
  0x29   :  { %p1502_p4 = por %p1501_p3, %p1500_p2 }
  0x2b   :  { %p1503_p5 = pnand %p1502_p4, %p1496_p1 }
  0x2d   :  { %1506 = shalt.err (!%p1503_p5)
}
  0x2e   :  { %55 = dma.hbm_to_vmem [thread:$0]  %s1803_s3, 2048, %s50_s28, [#allocation6], %s1560_s21, %s1560_s21, %s1561_s22  }
  0x2f   :  { %s1515_s0 = scalar_lea.vmem %s78_s5, 2048  ;;  %p1520_p7 = scmp.lt.s32.totalorder %s78_s5, %s78_s5 }
  0x30   :  { %p1516_p6 = scmp.ne.s32.totalorder %s78_s5, %s1515_s0  ;;  %p1521_p8 = scmp.lt.s32.totalorder %s1515_s0, %s1515_s0 }
  0x32   :  { %p1522_p9 = por %p1521_p8, %p1520_p7 }
  0x34   :  { %p1523_p10 = pnand %p1522_p9, %p1516_p6 }
  0x36   :  { %1526 = shalt.err (!%p1523_p10)
}
  0x37   :  { %83 = dma.hbm_to_vmem [thread:$0]  %s1807_s7, 2048, %s78_s5, [#allocation9], %s1560_s21, %s1560_s21, %s1561_s22  }
  0x38   :  { %1547 = dma.done.wait [#allocation3], 512  }
  0x39   :  { %1548 = vsyncadd [#allocation3], 4294966784 }
  0x3a   :  { %1549 = dma.done.wait [#allocation6], 6144  }
  0x3b   :  { %1550 = vsyncadd [#allocation6], 4294961152 }
  0x3c   :  { %1551 = dma.done.wait [#allocation9], 4096  }
  0x3d   :  { %1552 = vsyncadd [#allocation9], 4294963200  ;;  %v1331_v0 = vld [vmem:[#allocation5 + $0x74] ss:$8 sps:$4 sm:$0xff]   ;;  %v1333_v1 = vld [vmem:[#allocation5 + $0x70] ss:$8 sps:$4 sm:$0xff]   ;;  %v102_v6 = vlaneseq }
  0x3e   :  { %396 = vmatprep.subr.bf16.mxu0 %v1331_v0  ;;  %v1334_v2 = vld [vmem:[#allocation5 + $0x64] ss:$8 sps:$4 sm:$0xff]   ;;  %v1336_v3 = vld [vmem:[#allocation5 + $0x60] ss:$8 sps:$4 sm:$0xff]   ;;  %v1337_v4 = vld [vmem:[#allocation5 + $0x54] ss:$8 sps:$4 sm:$0xff]  }
  0x3f   :  { %397 = vmatpush1.bf16.msra.mxu0 %v1333_v1  ;;  %v1339_v5 = vld [vmem:[#allocation5 + $0x50] ss:$8 sps:$4 sm:$0xff]   ;;  %v1340_v7 = vld [vmem:[#allocation5 + $0x44] ss:$8 sps:$4 sm:$0xff]   ;;  %v1342_v8 = vld [vmem:[#allocation5 + $0x40] ss:$8 sps:$4 sm:$0xff]  }
  0x40   :  { %398 = vmatprep.subr.bf16.mxu0 %v1334_v2  ;;  %v1646_v9 = vshrl.u32 %v102_v6, 7  ;;  %v1343_v10 = vld [vmem:[#allocation5 + $0x34] ss:$8 sps:$4 sm:$0xff]   ;;  %v1345_v11 = vld [vmem:[#allocation5 + $0x30] ss:$8 sps:$4 sm:$0xff]   ;;  %v1651_v17 = vld [vmem:[#allocation2] sm:$0xff] }
  0x41   :  { %v1346_v13 = vld [vmem:[#allocation5 + $0x24] ss:$8 sps:$4 sm:$0xff]   ;;  %v1348_v14 = vld [vmem:[#allocation5 + $0x20] ss:$8 sps:$4 sm:$0xff]   ;;  %v1349_v15 = vld [vmem:[#allocation5 + $0x14] ss:$8 sps:$4 sm:$0xff]  }
  0x42   :  { %v111_v12 = vand.u32 15, %v1646_v9  ;;  %v1351_v16 = vld [vmem:[#allocation5 + $0x10] ss:$8 sps:$4 sm:$0xff]   ;;  %v1653_v18 = vld [vmem:[#allocation2 + $0x8] sm:$0xff]  ;;  %vm173_vm1 = vcmp.lt.s32.totalorder %v1646_v9, 1  ;;  %v169_v21 = vrot.slane %v1651_v17, 7 }
  0x43   :  { %399 = vmatpush1.bf16.msra.mxu0 %v1336_v3  ;;  %v1352_v19 = vld [vmem:[#allocation5 + $0x4] ss:$8 sps:$4 sm:$0xff]   ;;  %v1656_v20 = vld [vmem:[#allocation2 + $0x18] sm:$0xff]  ;;  %v170_v22 = vrot.slane %v1653_v18, 7  ;;  %vm1564_vm2 = vmmov 1   ;;  %v1666_v25 = vld [vmem:[#allocation2 + $0x10] sm:$0xff]  ;;  %v167_v56 = vpack.c.bf16 %v1653_v18, %v1651_v17 }
  0x44   :  { %400 = vmatprep.subr.bf16.mxu0 %v1337_v4  ;;  %vm155_vm0 = vcmp.ge.s32.totalorder %v111_v12, 1  ;;  %v172_v24 = vrot.slane %v1656_v20, 7  ;;  %v1379_v27 = vld [vmem:[#allocation7 + $0x78] sm:$0xff]   ;;  %v1354_v28 = vld [vmem:[#allocation5] ss:$8 sps:$4 sm:$0xff]   ;;  %v1381_v32 = vld [vmem:[#allocation7 + $0x70] sm:$0xff]   ;;  %v168_v59 = vpack.c.bf16 %v1656_v20, %v1666_v25 }
  0x45   :  { %vm1661_vm3 = vmpackc.low %vm1564_vm2, %vm155_vm0  ;;  %v176_v26 = vsel %vm173_vm1, %v169_v21, %v170_v22  ;;  %v1380_v30 = vld [vmem:[#allocation7 + $0x38] sm:$0xff]   ;;  %1220 = vmatprep.subr.bf16.mxu1 %v1379_v27  ;;  %v1673_v33 = vadd.s32 16, %v1646_v9  ;;  %v1382_v34 = vld [vmem:[#allocation7 + $0x30] sm:$0xff]   ;;  %v171_v36 = vrot.slane %v1666_v25, 7  ;;  %vm159_vm6 = vcmp.ge.s32.totalorder %v111_v12, 2 }
  0x46   :  { %v177_v29 = vsel %vm173_vm1, %v172_v24, %v169_v21  ;;  %1221 = vmatpush3.bf16.msra.mxu1 %v1380_v30  ;;  %v1355_v35 = vld [vmem:[#allocation5 + $0xf4] ss:$8 sps:$4 sm:$0xff]   ;;  %v1383_v37 = vld [vmem:[#allocation7 + $0x68] sm:$0xff]   ;;  %v1357_v38 = vld [vmem:[#allocation5 + $0xf0] ss:$8 sps:$4 sm:$0xff]   ;;  %vm671_vm7 = vcmp.lt.s32.totalorder %v1646_v9, 2 }
  0x47   :  { %401 = vmatpush1.bf16.msra.mxu0 %v1339_v5  ;;  %v1146_v31 = vpack.c.bf16 %v176_v26, %v177_v29  ;;  %1222 = vmatprep.subr.bf16.mxu1 %v1381_v32  ;;  %v1358_v39 = vld [vmem:[#allocation5 + $0xe4] ss:$8 sps:$4 sm:$0xff]   ;;  %v1360_v40 = vld [vmem:[#allocation5 + $0xe0] ss:$8 sps:$4 sm:$0xff]   ;;  %v1361_v41 = vld [vmem:[#allocation5 + $0xd4] ss:$8 sps:$4 sm:$0xff]   ;;  %v174_v54 = vsel %vm173_vm1, %v171_v36, %v172_v24  ;;  %v175_v55 = vsel %vm173_vm1, %v170_v22, %v171_v36 }
  0x48   :  { %402 = vmatprep.subr.bf16.mxu0 %v1340_v7  ;;  %v1363_v42 = vld [vmem:[#allocation5 + $0xd0] ss:$8 sps:$4 sm:$0xff]   ;;  %v1364_v43 = vld [vmem:[#allocation5 + $0xc4] ss:$8 sps:$4 sm:$0xff]   ;;  %v1366_v44 = vld [vmem:[#allocation5 + $0xc0] ss:$8 sps:$4 sm:$0xff]   ;;  %v1149_v57 = vpack.c.bf16 %v174_v54, %v175_v55 }
  0x49   :  { %1147 = vmatprep.mubr.msk.bf16.mxu0 %vm1661_vm3, %v1146_v31  ;;  %v1367_v45 = vld [vmem:[#allocation5 + $0xb4] ss:$8 sps:$4 sm:$0xff]   ;;  %v1369_v46 = vld [vmem:[#allocation5 + $0xb0] ss:$8 sps:$4 sm:$0xff]   ;;  %v1370_v47 = vld [vmem:[#allocation5 + $0xa4] ss:$8 sps:$4 sm:$0xff]  }
  0x4a   :  { %1223 = vmatpush3.bf16.msra.mxu1 %v1382_v34  ;;  %v1372_v48 = vld [vmem:[#allocation5 + $0xa0] ss:$8 sps:$4 sm:$0xff]   ;;  %v1373_v49 = vld [vmem:[#allocation5 + $0x94] ss:$8 sps:$4 sm:$0xff]   ;;  %v1375_v50 = vld [vmem:[#allocation5 + $0x90] ss:$8 sps:$4 sm:$0xff]  }
  0x4b   :  { %403 = vmatpush1.bf16.msra.mxu0 %v1342_v8  ;;  %1224 = vmatprep.subr.bf16.mxu1 %v1383_v37  ;;  %v1376_v51 = vld [vmem:[#allocation5 + $0x84] ss:$8 sps:$4 sm:$0xff]   ;;  %v125_v52 = vand.u32 15, %v1673_v33  ;;  %v1378_v53 = vld [vmem:[#allocation5 + $0x80] ss:$8 sps:$4 sm:$0xff]   ;;  %v1387_v63 = vld [vmem:[#allocation7 + $0x58] sm:$0xff]  }
  0x4c   :  { %404 = vmatprep.subr.bf16.mxu0 %v1343_v10  ;;  %v1384_v60 = vld [vmem:[#allocation7 + $0x28] sm:$0xff]   ;;  %v1385_v61 = vld [vmem:[#allocation7 + $0x60] sm:$0xff]   ;;  %v1388_v0 = vld [vmem:[#allocation7 + $0x18] sm:$0xff]   ;;  %v228_v10 = vsub.s32 0, %v1646_v9 }
  0x4d   :  { %vm157_vm4 = vcmp.ge.s32.totalorder %v125_v52, 1  ;;  %v1386_v62 = vld [vmem:[#allocation7 + $0x20] sm:$0xff]   ;;  %v1389_v1 = vld [vmem:[#allocation7 + $0x50] sm:$0xff]   ;;  %v1391_v3 = vld [vmem:[#allocation7 + $0x48] sm:$0xff]   ;;  %vm161_vm8 = vcmp.ge.s32.totalorder %v125_v52, 2 }
  0x4e   :  { %vm1688_vm5 = vmpackc.low %vm1564_vm2, %vm157_vm4  ;;  %1225 = vmatpush3.bf16.msra.mxu1 %v1384_v60  ;;  %v1390_v2 = vld [vmem:[#allocation7 + $0x10] sm:$0xff]   ;;  %v1392_v4 = vld [vmem:[#allocation7 + $0x8] sm:$0xff]  }
  0x4f   :  { %405 = vmatpush1.bf16.msra.mxu0 %v1345_v11  ;;  %1226 = vmatprep.subr.bf16.mxu1 %v1385_v61  ;;  %v1393_v5 = vld [vmem:[#allocation7 + $0x40] sm:$0xff]   ;;  %v1395_v7 = vld [vmem:[#allocation8 + $0x78] sm:$0xff]   ;;  %v1408_v54 = vld [vmem:[#allocation8 + $0x8] sm:$0xff]  }
  0x50   :  { %406 = vmatprep.subr.bf16.mxu0 %v1346_v13  ;;  %v1394_v6 = vld [vmem:[#allocation7] sm:$0xff]   ;;  %v1412_v58 = vld [vmem:[#allocation10 + $0x38] sm:$0xff]   ;;  %vm1751_vm9 = vmpackc.low %vm1564_vm2, %vm159_vm6 }
  0x51   :  { %v1700_v11 = vld [vmem:[%s1802_s2] sm:$0x3]  ;;  %vm1762_vm10 = vmpackc.low %vm1564_vm2, %vm161_vm8 }
  0x52   :  { %1227 = vmatpush3.bf16.msra.mxu1 %v1386_v62  ;;  %v1402_v23 = vld [vmem:[#allocation8 + $0x20] sm:$0xff]  }
  0x53   :  { %407 = vmatpush1.bf16.msra.mxu0 %v1348_v14  ;;  %1228 = vmatprep.subr.bf16.mxu1 %v1387_v63  ;;  %v1409_v55 = vld [vmem:[#allocation8 + $0x40] sm:$0xff]  }
  0x54   :  { %408 = vmatprep.subr.bf16.mxu0 %v1349_v15  ;;  %v229_v15 = vrot.slane %v1700_v11, %v228_v10 }
  0x56   :  { %1229 = vmatpush3.bf16.msra.mxu1 %v1388_v0  ;;  %v232_v0 = vsub.s32 1, %v1646_v9 }
  0x57   :  { %409 = vmatpush1.bf16.msra.mxu0 %v1351_v16  ;;  %1230 = vmatprep.subr.bf16.mxu1 %v1389_v1  ;;  %v1151_v1 = vld [vmem:[%s1804_s4] ss:$0 sm:$0xff] }
  0x58   :  { %410 = vmatprep.subr.bf16.mxu0 %v1352_v19 }
  0x5a   :  { %1231 = vmatpush3.bf16.msra.mxu1 %v1390_v2 }
  0x5b   :  { %411 = vmatpush1.bf16.msra.mxu0 %v1354_v28  ;;  %1232 = vmatprep.subr.bf16.mxu1 %v1391_v3 }
  0x5c   :  { %412 = vmatprep.subr.bf16.mxu0 %v1355_v35 }
  0x5e   :  { %1233 = vmatpush3.bf16.msra.mxu1 %v1392_v4 }
  0x5f   :  { %413 = vmatpush2.bf16.msra.mxu0 %v1357_v38  ;;  %1234 = vmatprep.subr.bf16.mxu1 %v1393_v5 }
  0x60   :  { %414 = vmatprep.subr.bf16.mxu0 %v1358_v39 }
  0x62   :  { %1235 = vmatpush3.bf16.msra.mxu1 %v1394_v6 }
  0x63   :  { %415 = vmatpush2.bf16.msra.mxu0 %v1360_v40  ;;  %1248 = vmatprep.subr.bf16.mxu1 %v1395_v7  ;;  %v233_v7 = vrot.slane %v1700_v11, %v232_v0 }
  0x64   :  { %416 = vmatprep.subr.bf16.mxu0 %v1361_v41 }
  0x67   :  { %417 = vmatpush2.bf16.msra.mxu0 %v1363_v42  ;;  %v1396_v42 = vld [vmem:[#allocation8 + $0x38] sm:$0xff]  }
  0x68   :  { %418 = vmatprep.subr.bf16.mxu0 %v1364_v43  ;;  %v1397_v43 = vld [vmem:[#allocation8 + $0x70] sm:$0xff]  }
  0x6b   :  { %419 = vmatpush2.bf16.msra.mxu0 %v1366_v44  ;;  %v1398_v44 = vld [vmem:[#allocation8 + $0x30] sm:$0xff]  }
  0x6c   :  { %420 = vmatprep.subr.bf16.mxu0 %v1367_v45  ;;  %v1399_v45 = vld [vmem:[#allocation8 + $0x68] sm:$0xff]  }
  0x6f   :  { %421 = vmatpush2.bf16.msra.mxu0 %v1369_v46  ;;  %v1400_v46 = vld [vmem:[#allocation8 + $0x28] sm:$0xff]  }
  0x70   :  { %422 = vmatprep.subr.bf16.mxu0 %v1370_v47  ;;  %v1401_v47 = vld [vmem:[#allocation8 + $0x60] sm:$0xff]  }
  0x73   :  { %423 = vmatpush2.bf16.msra.mxu0 %v1372_v48  ;;  %v1403_v48 = vld [vmem:[#allocation8 + $0x58] sm:$0xff]  }
  0x74   :  { %424 = vmatprep.subr.bf16.mxu0 %v1373_v49  ;;  %v1404_v49 = vld [vmem:[#allocation8 + $0x18] sm:$0xff]  }
  0x77   :  { %425 = vmatpush2.bf16.msra.mxu0 %v1375_v50  ;;  %v1405_v50 = vld [vmem:[#allocation8 + $0x50] sm:$0xff]  }
  0x78   :  { %426 = vmatprep.subr.bf16.mxu0 %v1376_v51  ;;  %v1406_v51 = vld [vmem:[#allocation8 + $0x10] sm:$0xff]  }
  0x7b   :  { %427 = vmatpush2.bf16.msra.mxu0 %v1378_v53  ;;  %v1407_v53 = vld [vmem:[#allocation8 + $0x48] sm:$0xff]  }
  0x7e   :  { %429 = vmatmul.mubr.bf16.vlgmr.msra.gmra.mxu0 %v167_v56  ;;  %v1410_v56 = vld [vmem:[#allocation8] sm:$0xff]  }
  0x7f   :  { %1150 = vmatprep.mubr.msk.bf16.mxu0 %vm1688_vm5, %v1149_v57  ;;  %v1411_v57 = vld [vmem:[#allocation10 + $0x78] sm:$0xff]  }
  0x80   :  { %1276 = vmatprep.subr.bf16.mxu0 %v1411_v57 }
  0x81   :  { %1277 = vmatpush3.bf16.msra.mxu0 %v1412_v58 }
  0x86   :  { %439 = vmatmul.mubr.bf16.gmra.mxu0 %v168_v59  ;;  %v1413_v59 = vld [vmem:[#allocation10 + $0x70] sm:$0xff]  }
  0x87   :  { %1278 = vmatprep.subr.bf16.mxu0 %v1413_v59 }
 0x13e   :  { %v430_v8 = vpop.f32.mrf.mxu0 }
 0x13f   :  { %v431_v19 = vadd.f32 %v430_v8, %v229_v15 }
 0x140   :  { %v1702_v13 = vpop.f32.mrf.mxu0 }
 0x141   :  { %v449_v25 = vmax.f32 %v431_v19, 0.0 }
 0x142   :  { %v434_v14 = vpop.f32.mrf.mxu0 }
 0x143   :  { %v435_v17 = vadd.f32 %v434_v14, %v229_v15  ;;  %v455_v30 = vrot.slane %v449_v25, 7 }
 0x144   :  { %v1705_v16 = vpop.f32.mrf.mxu0 }
 0x145   :  { %v450_v22 = vmax.f32 %v435_v17, 0.0  ;;  %v437_v17 = vadd.f32 %v1705_v16, %v233_v7 }
 0x146   :  { %v440_v18 = vpop.f32.mrf.mxu0 }
 0x147   :  { %v441_v20 = vadd.f32 %v440_v18, %v229_v15  ;;  %v456_v28 = vrot.slane %v450_v22, 7  ;;  %v453_v38 = vpack.c.bf16 %v450_v22, %v449_v25 }
 0x148   :  { %v1707_v21 = vpop.f32.mrf.mxu0 }
 0x149   :  { %v451_v26 = vmax.f32 %v441_v20, 0.0  ;;  %v461_v35 = vsel %vm173_vm1, %v455_v30, %v456_v28  ;;  %v433_v20 = vadd.f32 %v1702_v13, %v233_v7 }
 0x14a   :  { %v444_v24 = vpop.f32.mrf.mxu0 }
 0x14b   :  { %v445_v27 = vadd.f32 %v444_v24, %v229_v15  ;;  %v457_v31 = vrot.slane %v451_v26, 7  ;;  %v443_v24 = vadd.f32 %v1707_v21, %v233_v7 }
 0x14d   :  { %v452_v29 = vmax.f32 %v445_v27, 0.0  ;;  %v460_v39 = vsel %vm173_vm1, %v456_v28, %v457_v31  ;;  %v446_v28 = vpop.f32.mrf.mxu0 }
 0x14f   :  { %v458_v32 = vrot.slane %v452_v29, 7  ;;  %v454_v41 = vpack.c.bf16 %v452_v29, %v451_v26 }
 0x151   :  { %v459_v34 = vsel %vm173_vm1, %v457_v31, %v458_v32  ;;  %v462_v36 = vsel %vm173_vm1, %v458_v32, %v455_v30  ;;  %v447_v31 = vadd.f32 %v446_v28, %v233_v7 }
 0x152   :  { %v1169_v37 = vpack.c.bf16 %v461_v35, %v462_v36  ;;  %v1172_v40 = vpack.c.bf16 %v459_v34, %v460_v39 }
 0x154   :  { %1170 = vmatprep.mubr.msk.bf16.mxu1 %vm1661_vm3, %v1169_v37 }
 0x155   :  { %637 = vmatmul.mubr.bf16.vlgmr.msra.gmra.mxu1 %v453_v38 }
 0x156   :  { %1173 = vmatprep.mubr.msk.bf16.mxu1 %vm1688_vm5, %v1172_v40  ;;  %1249 = vmatpush3.bf16.msra.mxu1 %v1396_v42 }
 0x157   :  { %1250 = vmatprep.subr.bf16.mxu1 %v1397_v43 }
 0x15a   :  { %1251 = vmatpush3.bf16.msra.mxu1 %v1398_v44 }
 0x15b   :  { %1252 = vmatprep.subr.bf16.mxu1 %v1399_v45 }
 0x15d   :  { %645 = vmatmul.mubr.bf16.gmra.mxu1 %v454_v41 }
 0x15e   :  { %1253 = vmatpush3.bf16.msra.mxu1 %v1400_v46 }
 0x15f   :  { %1254 = vmatprep.subr.bf16.mxu1 %v1401_v47  ;;  %v1414_v47 = vld [vmem:[#allocation10 + $0x30] sm:$0xff]  }
 0x160   :  { %1279 = vmatpush3.bf16.msra.mxu0 %v1414_v47 }
 0x162   :  { %1255 = vmatpush3.bf16.msra.mxu1 %v1402_v23  ;;  %v1415_v23 = vld [vmem:[#allocation10 + $0x68] sm:$0xff]  }
 0x163   :  { %1256 = vmatprep.subr.bf16.mxu1 %v1403_v48  ;;  %v1416_v48 = vld [vmem:[#allocation10 + $0x28] sm:$0xff]   ;;  %1280 = vmatprep.subr.bf16.mxu0 %v1415_v23 }
 0x164   :  { %1281 = vmatpush3.bf16.msra.mxu0 %v1416_v48 }
 0x166   :  { %1257 = vmatpush3.bf16.msra.mxu1 %v1404_v49  ;;  %v1417_v49 = vld [vmem:[#allocation10 + $0x60] sm:$0xff]  }
 0x167   :  { %1258 = vmatprep.subr.bf16.mxu1 %v1405_v50  ;;  %v1418_v50 = vld [vmem:[#allocation10 + $0x20] sm:$0xff]   ;;  %1282 = vmatprep.subr.bf16.mxu0 %v1417_v49 }
 0x168   :  { %1283 = vmatpush3.bf16.msra.mxu0 %v1418_v50 }
 0x16a   :  { %1259 = vmatpush3.bf16.msra.mxu1 %v1406_v51  ;;  %v1419_v51 = vld [vmem:[#allocation10 + $0x58] sm:$0xff]  }
 0x16b   :  { %1260 = vmatprep.subr.bf16.mxu1 %v1407_v53  ;;  %v1420_v53 = vld [vmem:[#allocation10 + $0x18] sm:$0xff]   ;;  %1284 = vmatprep.subr.bf16.mxu0 %v1419_v51 }
 0x16c   :  { %1285 = vmatpush3.bf16.msra.mxu0 %v1420_v53 }
 0x16e   :  { %1261 = vmatpush3.bf16.msra.mxu1 %v1408_v54  ;;  %v1421_v54 = vld [vmem:[#allocation10 + $0x50] sm:$0xff]  }
 0x16f   :  { %1262 = vmatprep.subr.bf16.mxu1 %v1409_v55  ;;  %v1422_v55 = vld [vmem:[#allocation10 + $0x10] sm:$0xff]   ;;  %1286 = vmatprep.subr.bf16.mxu0 %v1421_v54 }
 0x170   :  { %1287 = vmatpush3.bf16.msra.mxu0 %v1422_v55 }
 0x172   :  { %1263 = vmatpush3.bf16.msra.mxu1 %v1410_v56  ;;  %v1423_v56 = vld [vmem:[#allocation10 + $0x48] sm:$0xff]  }
 0x173   :  { %1304 = vmatprep.subr.bf16.mxu1 %v1411_v57  ;;  %v1424_v57 = vld [vmem:[#allocation10 + $0x8] sm:$0xff]   ;;  %1288 = vmatprep.subr.bf16.mxu0 %v1423_v56 }
 0x174   :  { %1289 = vmatpush3.bf16.msra.mxu0 %v1424_v57 }
 0x215   :  { %v1236_v60 = vpop.f32.mrf.mxu1 }
 0x217   :  { %v1237_v61 = vpop.f32.mrf.mxu1 }
 0x218   :  { %v1238_v63 = vadd.f32 %v1237_v61, %v1236_v60 }
 0x219   :  { %v1239_v62 = vpop.f32.mrf.mxu1 }
 0x21a   :  { %v639_v5 = vadd.f32 %v1238_v63, %v1151_v1 }
 0x21b   :  { %v1240_v2 = vpop.f32.mrf.mxu1 }
 0x21c   :  { %v1241_v3 = vadd.f32 %v1240_v2, %v1239_v62  ;;  %v653_v18 = vmax.f32 %v639_v5, 0.0 }
 0x21d   :  { %v1242_v4 = vpop.f32.mrf.mxu1 }
 0x21e   :  { %v642_v6 = vadd.f32 %v1241_v3, %v1151_v1  ;;  %v657_v29 = vadd.f32 %v653_v18, %v433_v20  ;;  %v1174_v3 = vld [vmem:[%s1806_s6] ss:$0 sm:$0xff] }
 0x21f   :  { %v1243_v8 = vpop.f32.mrf.mxu1 }
 0x220   :  { %v654_v10 = vmax.f32 %v642_v6, 0.0  ;;  %v1244_v14 = vadd.f32 %v1243_v8, %v1242_v4  ;;  %v1731_v35 = vmax.f32 %v657_v29, 0.0 }
 0x221   :  { %v1245_v15 = vpop.f32.mrf.mxu1 }
 0x222   :  { %v647_v19 = vadd.f32 %v1244_v14, %v1151_v1  ;;  %v658_v25 = vadd.f32 %v654_v10, %v437_v17  ;;  %v667_v21 = vrot.slane %v1731_v35, 6 }
 0x223   :  { %v1246_v22 = vpop.f32.mrf.mxu1 }
 0x224   :  { %v655_v26 = vmax.f32 %v647_v19, 0.0  ;;  %v1247_v27 = vadd.f32 %v1246_v22, %v1245_v15  ;;  %v1729_v32 = vmax.f32 %v658_v25, 0.0 }
 0x226   :  { %v659_v30 = vadd.f32 %v655_v26, %v443_v24  ;;  %v650_v11 = vadd.f32 %v1247_v27, %v1151_v1  ;;  %v668_v13 = vrot.slane %v1729_v32, 6  ;;  %v665_v44 = vpack.c.bf16 %v1729_v32, %v1731_v35 }
 0x228   :  { %v656_v34 = vmax.f32 %v650_v11, 0.0  ;;  %v1733_v16 = vmax.f32 %v659_v30, 0.0  ;;  %v674_v40 = vsel %vm671_vm7, %v667_v21, %v668_v13 }
 0x22a   :  { %v660_v36 = vadd.f32 %v656_v34, %v447_v31  ;;  %v669_v38 = vrot.slane %v1733_v16, 6 }
 0x22c   :  { %v1736_v37 = vmax.f32 %v660_v36, 0.0  ;;  %v673_v33 = vsel %vm671_vm7, %v668_v13, %v669_v38 }
 0x22e   :  { %v670_v39 = vrot.slane %v1736_v37, 6  ;;  %v666_v46 = vpack.c.bf16 %v1736_v37, %v1733_v16 }
 0x230   :  { %v675_v41 = vsel %vm671_vm7, %v670_v39, %v667_v21  ;;  %v672_v42 = vsel %vm671_vm7, %v669_v38, %v670_v39  ;;  %v1197_v39 = vld [vmem:[%s1808_s8] ss:$0 sm:$0xff]  ;;  %s1565_s8 = smov [#allocation11]  }
 0x231   :  { %v1192_v43 = vpack.c.bf16 %v674_v40, %v675_v41  ;;  %v1195_v45 = vpack.c.bf16 %v672_v42, %v673_v33  ;;  %s1099_s19 = sshll.u32 %s1565_s8, 4  ;;  %s1100_s19 = int_to_ptr.vmem [resolvable:$true] %s1099_s19 }
 0x232   :  { %s1527_s20 = scalar_lea.vmem %s1100_s19, 512  ;;  %p1532_p12 = scmp.lt.s32.totalorder %s1100_s19, %s1100_s19 }
 0x233   :  { %1193 = vmatprep.mubr.msk.bf16.mxu1 %vm1751_vm9, %v1192_v43  ;;  %p1528_p11 = scmp.ne.s32.totalorder %s1100_s19, %s1527_s20  ;;  %p1533_p13 = scmp.lt.s32.totalorder %s1527_s20, %s1527_s20 }
 0x234   :  { %858 = vmatmul.mubr.bf16.vlgmr.msra.gmra.mxu1 %v665_v44 }
 0x235   :  { %1196 = vmatprep.mubr.msk.bf16.mxu1 %vm1762_vm10, %v1195_v45  ;;  %1312 = vmatpush3.bf16.msra.mxu1 %v1412_v58  ;;  %v1425_v58 = vld [vmem:[#allocation10 + $0x40] sm:$0xff]   ;;  %p1534_p0 = por %p1533_p13, %p1532_p12 }
 0x236   :  { %1305 = vmatprep.subr.bf16.mxu1 %v1413_v59  ;;  %v1426_v59 = vld [vmem:[#allocation10] sm:$0xff]   ;;  %1290 = vmatprep.subr.bf16.mxu0 %v1425_v58 }
 0x237   :  { %1291 = vmatpush3.bf16.msra.mxu0 %v1426_v59  ;;  %p1535_p1 = pnand %p1534_p0, %p1528_p11 }
 0x239   :  { %1313 = vmatpush3.bf16.msra.mxu1 %v1414_v47 }
 0x23a   :  { %1306 = vmatprep.subr.bf16.mxu1 %v1415_v23 }
 0x23c   :  { %866 = vmatmul.mubr.bf16.gmra.mxu1 %v666_v46 }
 0x23d   :  { %1314 = vmatpush3.bf16.msra.mxu1 %v1416_v48 }
 0x23e   :  { %1307 = vmatprep.subr.bf16.mxu1 %v1417_v49 }
 0x241   :  { %1315 = vmatpush3.bf16.msra.mxu1 %v1418_v50 }
 0x242   :  { %1308 = vmatprep.subr.bf16.mxu1 %v1419_v51 }
 0x245   :  { %1316 = vmatpush3.bf16.msra.mxu1 %v1420_v53 }
 0x246   :  { %1309 = vmatprep.subr.bf16.mxu1 %v1421_v54 }
 0x249   :  { %1317 = vmatpush3.bf16.msra.mxu1 %v1422_v55 }
 0x24a   :  { %1310 = vmatprep.subr.bf16.mxu1 %v1423_v56 }
 0x24d   :  { %1318 = vmatpush3.bf16.msra.mxu1 %v1424_v57 }
 0x24e   :  { %1311 = vmatprep.subr.bf16.mxu1 %v1425_v58 }
 0x251   :  { %1319 = vmatpush3.bf16.msra.mxu1 %v1426_v59 }
 0x2f4   :  { %v1264_v60 = vpop.f32.mrf.mxu1 }
 0x2f6   :  { %v1265_v61 = vpop.f32.mrf.mxu1 }
 0x2f7   :  { %v1266_v2 = vadd.f32 %v1265_v61, %v1264_v60 }
 0x2f8   :  { %v1267_v62 = vpop.f32.mrf.mxu1 }
 0x2f9   :  { %v860_v8 = vadd.f32 %v1266_v2, %v1174_v3 }
 0x2fa   :  { %v1268_v63 = vpop.f32.mrf.mxu1 }
 0x2fb   :  { %v1269_v0 = vadd.f32 %v1268_v63, %v1267_v62  ;;  %v874_v19 = vmax.f32 %v860_v8, 0.0 }
 0x2fc   :  { %v1270_v1 = vpop.f32.mrf.mxu1 }
 0x2fd   :  { %v863_v5 = vadd.f32 %v1269_v0, %v1174_v3  ;;  %v880_v26 = vrot.slane %v874_v19, 6 }
 0x2fe   :  { %v1271_v4 = vpop.f32.mrf.mxu1 }
 0x2ff   :  { %v1272_v6 = vadd.f32 %v1271_v4, %v1270_v1  ;;  %v875_v15 = vmax.f32 %v863_v5, 0.0 }
 0x300   :  { %v1273_v7 = vpop.f32.mrf.mxu1 }
 0x301   :  { %v868_v10 = vadd.f32 %v1272_v6, %v1174_v3  ;;  %v881_v22 = vrot.slane %v875_v15, 6  ;;  %v878_v36 = vpack.c.bf16 %v875_v15, %v874_v19 }
 0x302   :  { %v1274_v14 = vpop.f32.mrf.mxu1 }
 0x303   :  { %v876_v17 = vmax.f32 %v868_v10, 0.0  ;;  %v1275_v18 = vadd.f32 %v1274_v14, %v1273_v7  ;;  %v886_v28 = vsel %vm671_vm7, %v880_v26, %v881_v22 }
 0x305   :  { %v871_v20 = vadd.f32 %v1275_v18, %v1174_v3  ;;  %v882_v24 = vrot.slane %v876_v17, 6 }
 0x307   :  { %v877_v25 = vmax.f32 %v871_v20, 0.0  ;;  %v885_v11 = vsel %vm671_vm7, %v881_v22, %v882_v24 }
 0x309   :  { %v883_v27 = vrot.slane %v877_v25, 6  ;;  %v879_v13 = vpack.c.bf16 %v877_v25, %v876_v17 }
 0x30b   :  { %v887_v29 = vsel %vm671_vm7, %v883_v27, %v880_v26  ;;  %v884_v30 = vsel %vm671_vm7, %v882_v24, %v883_v27 }
 0x30c   :  { %v1215_v31 = vpack.c.bf16 %v886_v28, %v887_v29  ;;  %v1218_v34 = vpack.c.bf16 %v884_v30, %v885_v11 }
 0x30e   :  { %1216 = vmatprep.mubr.msk.bf16.mxu0 %vm1751_vm9, %v1215_v31  ;;  %1219 = vmatprep.mubr.msk.bf16.mxu1 %vm1762_vm10, %v1218_v34 }
 0x30f   :  { %1062 = vmatmul.mubr.bf16.vlgmr.msra.gmra.mxu0 %v878_v36  ;;  %1070 = vmatmul.mubr.bf16.vlgmr.msra.gmra.mxu1 %v879_v13 }
 0x3cf   :  { %v1292_v21 = vpop.f32.mrf.mxu0  ;;  %v1298_v38 = vpop.f32.mrf.mxu1 }
 0x3d1   :  { %v1293_v9 = vpop.f32.mrf.mxu0  ;;  %v1299_v40 = vpop.f32.mrf.mxu1 }
 0x3d2   :  { %v1294_v41 = vadd.f32 %v1293_v9, %v1292_v21  ;;  %v1300_v42 = vadd.f32 %v1299_v40, %v1298_v38 }
 0x3d3   :  { %v1295_v43 = vpop.f32.mrf.mxu0  ;;  %v1301_v44 = vpop.f32.mrf.mxu1 }
 0x3d4   :  { %v1064_v33 = vadd.f32 %v1294_v41, %v1197_v39  ;;  %v1072_v12 = vadd.f32 %v1300_v42, %v1197_v39 }
 0x3d5   :  { %v1296_v45 = vpop.f32.mrf.mxu0  ;;  %v1302_v46 = vpop.f32.mrf.mxu1 }
 0x3d6   :  { %v1078_v52 = vmax.f32 %v1064_v33, 0.0  ;;  %v1080_v47 = vmax.f32 %v1072_v12, 0.0  ;;  %v1297_v23 = vadd.f32 %v1296_v45, %v1295_v43  ;;  %v1303_v48 = vadd.f32 %v1302_v46, %v1301_v44 }
 0x3d8   :  { %v1082_v49 = vadd.f32 %v1078_v52, %v1731_v35  ;;  %v1084_v50 = vadd.f32 %v1080_v47, %v1733_v16  ;;  %v1067_v51 = vadd.f32 %v1297_v23, %v1197_v39  ;;  %v1075_v53 = vadd.f32 %v1303_v48, %v1197_v39 }
 0x3da   :  { %v1086_v54 = vmax.f32 %v1082_v49, 0.0  ;;  %v1088_v55 = vmax.f32 %v1084_v50, 0.0  ;;  %v1079_v56 = vmax.f32 %v1067_v51, 0.0  ;;  %v1081_v57 = vmax.f32 %v1075_v53, 0.0 }
 0x3dc   :  { %1090 = vst [vmem:[#allocation11] sm:$0xff] %v1086_v54  ;;  %1092 = vst [vmem:[#allocation11 + $0x10] sm:$0xff] %v1088_v55  ;;  %v1083_v58 = vadd.f32 %v1079_v56, %v1729_v32  ;;  %v1085_v59 = vadd.f32 %v1081_v57, %v1736_v37 }
 0x3de   :  { %v1087_v60 = vmax.f32 %v1083_v58, 0.0  ;;  %v1089_v61 = vmax.f32 %v1085_v59, 0.0 }
 0x3e0   :  { %1091 = vst [vmem:[#allocation11 + $0x8] sm:$0xff] %v1087_v60  ;;  %1093 = vst [vmem:[#allocation11 + $0x18] sm:$0xff] %v1089_v61 }
 0x3e1   :  { %1538 = shalt.err (!%p1535_p1)
}
 0x3e2   :  { %1105 = dma.vmem_to_hbm [thread:$0]  %s1100_s19, 512, %s1809_s9, [#allocation4], %s1556_s12, %s1556_s12, %s1557_s13  }
 0x3e3   :  { %1553 = dma.done.wait [#allocation4], 512  }
 0x3e4   :  { %1554 = vsyncadd [#allocation4], 4294966784 }
 0x3e5   :  { %1109 = vsyncpa [#allocation3], 1 }
 0x3e6   :  { %1110 = vsyncpa [#allocation6], 1 }
 0x3e7   :  { %1111 = vsyncpa [#allocation9], 1 }
 0x3e8   :  { %1112 = vsyncpa [#allocation4], 1 }

// kernel: tpu_custom_call.1
= control target key start
LH: loop header
LB: loop body
LE: loop exit
PB: predicated region body
PF: predicated region fallthrough
CT: control target
= control target key end

     0   :  { %14 = vsyncpa [#allocation3], 0  ;;  %s1800_s0 = inlined_call_operand.hbm [shape: f32[32,128], index: 0, kind: input, shape index: {}]   ;;  %s1801_s1 = inlined_call_operand.hbm [shape: bf16[256,256], index: 1, kind: input, shape index: {}]   ;;  %s1802_s2 = inlined_call_operand.vmem [shape: f32[1,256], index: 2, kind: input, shape index: {}]   ;;  %s1803_s3 = inlined_call_operand.hbm [shape: bf16[256,128], index: 3, kind: input, shape index: {}]   ;;  %s1804_s4 = inlined_call_operand.vmem [shape: f32[1,128], index: 4, kind: input, shape index: {}]   ;;  %s1805_s5 = inlined_call_operand.hbm [shape: bf16[256,128], index: 5, kind: input, shape index: {}]   ;;  %s1806_s6 = inlined_call_operand.vmem [shape: f32[1,128], index: 6, kind: input, shape index: {}]   ;;  %s1807_s7 = inlined_call_operand.hbm [shape: bf16[256,128], index: 7, kind: input, shape index: {}]   ;;  %s1808_s8 = inlined_call_operand.vmem [shape: f32[1,128], index: 8, kind: input, shape index: {}]   ;;  %s1809_s9 = inlined_call_operand.hbm [shape: f32[32,128], index: 9, kind: output, shape index: {}]  }
   0x1   :  { %15 = vsyncpa [#allocation6], 0 }
   0x2   :  { %16 = vsyncpa [#allocation9], 0 }
   0x3   :  { %17 = vsyncpa [#allocation4], 0  ;;  %s1555_s30 = smov [#allocation5]  }
   0x4   :  { %s35_s10 = sshll.u32 %s1555_s30, 4  ;;  %s36_s10 = int_to_ptr.vmem [resolvable:$true] %s35_s10 }
   0x5   :  { %s1435_s11 = scalar_lea.vmem %s36_s10, 4096  ;;  %p1440_p1 = scmp.lt.s32.totalorder %s36_s10, %s36_s10 }
   0x6   :  { %p1436_p0 = scmp.ne.s32.totalorder %s36_s10, %s1435_s11  ;;  %p1441_p2 = scmp.lt.s32.totalorder %s1435_s11, %s1435_s11 }
   0x8   :  { %p1442_p3 = por %p1441_p2, %p1440_p1 }
   0xa   :  { %p1443_p4 = pnand %p1442_p3, %p1436_p0 }
   0xc   :  { %1446 = shalt.err (!%p1443_p4)
}
   0xd   :  { %s1556_s12 = smov 128   ;;  %s1557_s13 = smov 8  }
   0xe   :  { %41 = dma.hbm_to_vmem [thread:$0]  %s1801_s1, 4096, %s36_s10, [#allocation6], %s1556_s12, %s1556_s12, %s1557_s13  }
   0xf   :  { %s1558_s16 = smov [#allocation8]   ;;  %s1559_s18 = smov [#allocation2]  }
  0x10   :  { %s63_s17 = sshll.u32 %s1558_s16, 4  ;;  %s23_s19 = sshll.u32 %s1559_s18, 4  ;;  %s64_s17 = int_to_ptr.vmem [resolvable:$true] %s63_s17  ;;  %s24_s19 = int_to_ptr.vmem [resolvable:$true] %s23_s19 }
  0x11   :  { %s1455_s20 = scalar_lea.vmem %s64_s17, 2048  ;;  %p1460_p6 = scmp.lt.s32.totalorder %s64_s17, %s64_s17 }
  0x12   :  { %p1456_p5 = scmp.ne.s32.totalorder %s64_s17, %s1455_s20  ;;  %p1461_p7 = scmp.lt.s32.totalorder %s1455_s20, %s1455_s20 }
  0x14   :  { %p1462_p8 = por %p1461_p7, %p1460_p6 }
  0x16   :  { %p1463_p9 = pnand %p1462_p8, %p1456_p5 }
  0x18   :  { %1466 = shalt.err (!%p1463_p9)
}
  0x19   :  { %s1560_s21 = smov 64   ;;  %s1561_s22 = smov 4  }
  0x1a   :  { %69 = dma.hbm_to_vmem [thread:$0]  %s1805_s5, 2048, %s64_s17, [#allocation9], %s1560_s21, %s1560_s21, %s1561_s22  }
  0x1b   :  { %s1475_s1 = scalar_lea.vmem %s24_s19, 512  ;;  %p1480_p11 = scmp.lt.s32.totalorder %s24_s19, %s24_s19 }
  0x1c   :  { %p1476_p10 = scmp.ne.s32.totalorder %s24_s19, %s1475_s1  ;;  %p1481_p12 = scmp.lt.s32.totalorder %s1475_s1, %s1475_s1 }
  0x1e   :  { %p1482_p13 = por %p1481_p12, %p1480_p11 }
  0x20   :  { %p1483_p0 = pnand %p1482_p13, %p1476_p10 }
  0x22   :  { %1486 = shalt.err (!%p1483_p0)
}
  0x23   :  { %29 = dma.hbm_to_vmem [thread:$0]  %s1800_s0, 512, %s24_s19, [#allocation3], %s1556_s12, %s1556_s12, %s1557_s13  }
  0x24   :  { %s1562_s27 = smov [#allocation7]   ;;  %s1563_s29 = smov [#allocation10]  }
  0x25   :  { %s49_s28 = sshll.u32 %s1562_s27, 4  ;;  %s77_s5 = sshll.u32 %s1563_s29, 4  ;;  %s50_s28 = int_to_ptr.vmem [resolvable:$true] %s49_s28  ;;  %s78_s5 = int_to_ptr.vmem [resolvable:$true] %s77_s5 }
  0x26   :  { %s1495_s30 = scalar_lea.vmem %s50_s28, 2048  ;;  %p1500_p2 = scmp.lt.s32.totalorder %s50_s28, %s50_s28 }
  0x27   :  { %p1496_p1 = scmp.ne.s32.totalorder %s50_s28, %s1495_s30  ;;  %p1501_p3 = scmp.lt.s32.totalorder %s1495_s30, %s1495_s30 }
  0x29   :  { %p1502_p4 = por %p1501_p3, %p1500_p2 }
  0x2b   :  { %p1503_p5 = pnand %p1502_p4, %p1496_p1 }
  0x2d   :  { %1506 = shalt.err (!%p1503_p5)
}
  0x2e   :  { %55 = dma.hbm_to_vmem [thread:$0]  %s1803_s3, 2048, %s50_s28, [#allocation6], %s1560_s21, %s1560_s21, %s1561_s22  }
  0x2f   :  { %s1515_s0 = scalar_lea.vmem %s78_s5, 2048  ;;  %p1520_p7 = scmp.lt.s32.totalorder %s78_s5, %s78_s5 }
  0x30   :  { %p1516_p6 = scmp.ne.s32.totalorder %s78_s5, %s1515_s0  ;;  %p1521_p8 = scmp.lt.s32.totalorder %s1515_s0, %s1515_s0 }
  0x32   :  { %p1522_p9 = por %p1521_p8, %p1520_p7 }
  0x34   :  { %p1523_p10 = pnand %p1522_p9, %p1516_p6 }
  0x36   :  { %1526 = shalt.err (!%p1523_p10)
}
  0x37   :  { %83 = dma.hbm_to_vmem [thread:$0]  %s1807_s7, 2048, %s78_s5, [#allocation9], %s1560_s21, %s1560_s21, %s1561_s22  }
  0x38   :  { %1547 = dma.done.wait [#allocation3], 512  }
  0x39   :  { %1548 = vsyncadd [#allocation3], 4294966784 }
  0x3a   :  { %1549 = dma.done.wait [#allocation6], 6144  }
  0x3b   :  { %1550 = vsyncadd [#allocation6], 4294961152 }
  0x3c   :  { %1551 = dma.done.wait [#allocation9], 4096  }
  0x3d   :  { %1552 = vsyncadd [#allocation9], 4294963200  ;;  %v1331_v0 = vld [vmem:[#allocation5 + $0x74] ss:$8 sps:$4 sm:$0xff]   ;;  %v1333_v1 = vld [vmem:[#allocation5 + $0x70] ss:$8 sps:$4 sm:$0xff]   ;;  %v102_v6 = vlaneseq }
  0x3e   :  { %396 = vmatprep.subr.bf16.mxu0 %v1331_v0  ;;  %v1334_v2 = vld [vmem:[#allocation5 + $0x64] ss:$8 sps:$4 sm:$0xff]   ;;  %v1336_v3 = vld [vmem:[#allocation5 + $0x60] ss:$8 sps:$4 sm:$0xff]   ;;  %v1337_v4 = vld [vmem:[#allocation5 + $0x54] ss:$8 sps:$4 sm:$0xff]  }
  0x3f   :  { %397 = vmatpush1.bf16.msra.mxu0 %v1333_v1  ;;  %v1339_v5 = vld [vmem:[#allocation5 + $0x50] ss:$8 sps:$4 sm:$0xff]   ;;  %v1340_v7 = vld [vmem:[#allocation5 + $0x44] ss:$8 sps:$4 sm:$0xff]   ;;  %v1342_v8 = vld [vmem:[#allocation5 + $0x40] ss:$8 sps:$4 sm:$0xff]  }
  0x40   :  { %398 = vmatprep.subr.bf16.mxu0 %v1334_v2  ;;  %v1646_v9 = vshrl.u32 %v102_v6, 7  ;;  %v1343_v10 = vld [vmem:[#allocation5 + $0x34] ss:$8 sps:$4 sm:$0xff]   ;;  %v1345_v11 = vld [vmem:[#allocation5 + $0x30] ss:$8 sps:$4 sm:$0xff]   ;;  %v1651_v17 = vld [vmem:[#allocation2] sm:$0xff] }
  0x41   :  { %v1346_v13 = vld [vmem:[#allocation5 + $0x24] ss:$8 sps:$4 sm:$0xff]   ;;  %v1348_v14 = vld [vmem:[#allocation5 + $0x20] ss:$8 sps:$4 sm:$0xff]   ;;  %v1349_v15 = vld [vmem:[#allocation5 + $0x14] ss:$8 sps:$4 sm:$0xff]  }
  0x42   :  { %v111_v12 = vand.u32 15, %v1646_v9  ;;  %v1351_v16 = vld [vmem:[#allocation5 + $0x10] ss:$8 sps:$4 sm:$0xff]   ;;  %v1653_v18 = vld [vmem:[#allocation2 + $0x8] sm:$0xff]  ;;  %vm173_vm1 = vcmp.lt.s32.totalorder %v1646_v9, 1  ;;  %v169_v21 = vrot.slane %v1651_v17, 7 }
  0x43   :  { %399 = vmatpush1.bf16.msra.mxu0 %v1336_v3  ;;  %v1352_v19 = vld [vmem:[#allocation5 + $0x4] ss:$8 sps:$4 sm:$0xff]   ;;  %v1656_v20 = vld [vmem:[#allocation2 + $0x18] sm:$0xff]  ;;  %v170_v22 = vrot.slane %v1653_v18, 7  ;;  %vm1564_vm2 = vmmov 1   ;;  %v1666_v25 = vld [vmem:[#allocation2 + $0x10] sm:$0xff]  ;;  %v167_v56 = vpack.c.bf16 %v1653_v18, %v1651_v17 }
  0x44   :  { %400 = vmatprep.subr.bf16.mxu0 %v1337_v4  ;;  %vm155_vm0 = vcmp.ge.s32.totalorder %v111_v12, 1  ;;  %v172_v24 = vrot.slane %v1656_v20, 7  ;;  %v1379_v27 = vld [vmem:[#allocation7 + $0x78] sm:$0xff]   ;;  %v1354_v28 = vld [vmem:[#allocation5] ss:$8 sps:$4 sm:$0xff]   ;;  %v1381_v32 = vld [vmem:[#allocation7 + $0x70] sm:$0xff]   ;;  %v168_v59 = vpack.c.bf16 %v1656_v20, %v1666_v25 }
  0x45   :  { %vm1661_vm3 = vmpackc.low %vm1564_vm2, %vm155_vm0  ;;  %v176_v26 = vsel %vm173_vm1, %v169_v21, %v170_v22  ;;  %v1380_v30 = vld [vmem:[#allocation7 + $0x38] sm:$0xff]   ;;  %1220 = vmatprep.subr.bf16.mxu1 %v1379_v27  ;;  %v1673_v33 = vadd.s32 16, %v1646_v9  ;;  %v1382_v34 = vld [vmem:[#allocation7 + $0x30] sm:$0xff]   ;;  %v171_v36 = vrot.slane %v1666_v25, 7  ;;  %vm159_vm6 = vcmp.ge.s32.totalorder %v111_v12, 2 }
  0x46   :  { %v177_v29 = vsel %vm173_vm1, %v172_v24, %v169_v21  ;;  %1221 = vmatpush3.bf16.msra.mxu1 %v1380_v30  ;;  %v1355_v35 = vld [vmem:[#allocation5 + $0xf4] ss:$8 sps:$4 sm:$0xff]   ;;  %v1383_v37 = vld [vmem:[#allocation7 + $0x68] sm:$0xff]   ;;  %v1357_v38 = vld [vmem:[#allocation5 + $0xf0] ss:$8 sps:$4 sm:$0xff]   ;;  %vm671_vm7 = vcmp.lt.s32.totalorder %v1646_v9, 2 }
  0x47   :  { %401 = vmatpush1.bf16.msra.mxu0 %v1339_v5  ;;  %v1146_v31 = vpack.c.bf16 %v176_v26, %v177_v29  ;;  %1222 = vmatprep.subr.bf16.mxu1 %v1381_v32  ;;  %v1358_v39 = vld [vmem:[#allocation5 + $0xe4] ss:$8 sps:$4 sm:$0xff]   ;;  %v1360_v40 = vld [vmem:[#allocation5 + $0xe0] ss:$8 sps:$4 sm:$0xff]   ;;  %v1361_v41 = vld [vmem:[#allocation5 + $0xd4] ss:$8 sps:$4 sm:$0xff]   ;;  %v174_v54 = vsel %vm173_vm1, %v171_v36, %v172_v24  ;;  %v175_v55 = vsel %vm173_vm1, %v170_v22, %v171_v36 }
  0x48   :  { %402 = vmatprep.subr.bf16.mxu0 %v1340_v7  ;;  %v1363_v42 = vld [vmem:[#allocation5 + $0xd0] ss:$8 sps:$4 sm:$0xff]   ;;  %v1364_v43 = vld [vmem:[#allocation5 + $0xc4] ss:$8 sps:$4 sm:$0xff]   ;;  %v1366_v44 = vld [vmem:[#allocation5 + $0xc0] ss:$8 sps:$4 sm:$0xff]   ;;  %v1149_v57 = vpack.c.bf16 %v174_v54, %v175_v55 }
  0x49   :  { %1147 = vmatprep.mubr.msk.bf16.mxu0 %vm1661_vm3, %v1146_v31  ;;  %v1367_v45 = vld [vmem:[#allocation5 + $0xb4] ss:$8 sps:$4 sm:$0xff]   ;;  %v1369_v46 = vld [vmem:[#allocation5 + $0xb0] ss:$8 sps:$4 sm:$0xff]   ;;  %v1370_v47 = vld [vmem:[#allocation5 + $0xa4] ss:$8 sps:$4 sm:$0xff]  }
  0x4a   :  { %1223 = vmatpush3.bf16.msra.mxu1 %v1382_v34  ;;  %v1372_v48 = vld [vmem:[#allocation5 + $0xa0] ss:$8 sps:$4 sm:$0xff]   ;;  %v1373_v49 = vld [vmem:[#allocation5 + $0x94] ss:$8 sps:$4 sm:$0xff]   ;;  %v1375_v50 = vld [vmem:[#allocation5 + $0x90] ss:$8 sps:$4 sm:$0xff]  }
  0x4b   :  { %403 = vmatpush1.bf16.msra.mxu0 %v1342_v8  ;;  %1224 = vmatprep.subr.bf16.mxu1 %v1383_v37  ;;  %v1376_v51 = vld [vmem:[#allocation5 + $0x84] ss:$8 sps:$4 sm:$0xff]   ;;  %v125_v52 = vand.u32 15, %v1673_v33  ;;  %v1378_v53 = vld [vmem:[#allocation5 + $0x80] ss:$8 sps:$4 sm:$0xff]   ;;  %v1387_v63 = vld [vmem:[#allocation7 + $0x58] sm:$0xff]  }
  0x4c   :  { %404 = vmatprep.subr.bf16.mxu0 %v1343_v10  ;;  %v1384_v60 = vld [vmem:[#allocation7 + $0x28] sm:$0xff]   ;;  %v1385_v61 = vld [vmem:[#allocation7 + $0x60] sm:$0xff]   ;;  %v1388_v0 = vld [vmem:[#allocation7 + $0x18] sm:$0xff]   ;;  %v228_v10 = vsub.s32 0, %v1646_v9 }
  0x4d   :  { %vm157_vm4 = vcmp.ge.s32.totalorder %v125_v52, 1  ;;  %v1386_v62 = vld [vmem:[#allocation7 + $0x20] sm:$0xff]   ;;  %v1389_v1 = vld [vmem:[#allocation7 + $0x50] sm:$0xff]   ;;  %v1391_v3 = vld [vmem:[#allocation7 + $0x48] sm:$0xff]   ;;  %vm161_vm8 = vcmp.ge.s32.totalorder %v125_v52, 2 }
  0x4e   :  { %vm1688_vm5 = vmpackc.low %vm1564_vm2, %vm157_vm4  ;;  %1225 = vmatpush3.bf16.msra.mxu1 %v1384_v60  ;;  %v1390_v2 = vld [vmem:[#allocation7 + $0x10] sm:$0xff]   ;;  %v1392_v4 = vld [vmem:[#allocation7 + $0x8] sm:$0xff]  }
  0x4f   :  { %405 = vmatpush1.bf16.msra.mxu0 %v1345_v11  ;;  %1226 = vmatprep.subr.bf16.mxu1 %v1385_v61  ;;  %v1393_v5 = vld [vmem:[#allocation7 + $0x40] sm:$0xff]   ;;  %v1395_v7 = vld [vmem:[#allocation8 + $0x78] sm:$0xff]   ;;  %v1408_v54 = vld [vmem:[#allocation8 + $0x8] sm:$0xff]  }
  0x50   :  { %406 = vmatprep.subr.bf16.mxu0 %v1346_v13  ;;  %v1394_v6 = vld [vmem:[#allocation7] sm:$0xff]   ;;  %v1412_v58 = vld [vmem:[#allocation10 + $0x38] sm:$0xff]   ;;  %vm1751_vm9 = vmpackc.low %vm1564_vm2, %vm159_vm6 }
  0x51   :  { %v1700_v11 = vld [vmem:[%s1802_s2] sm:$0x3]  ;;  %vm1762_vm10 = vmpackc.low %vm1564_vm2, %vm161_vm8 }
  0x52   :  { %1227 = vmatpush3.bf16.msra.mxu1 %v1386_v62  ;;  %v1402_v23 = vld [vmem:[#allocation8 + $0x20] sm:$0xff]  }
  0x53   :  { %407 = vmatpush1.bf16.msra.mxu0 %v1348_v14  ;;  %1228 = vmatprep.subr.bf16.mxu1 %v1387_v63  ;;  %v1409_v55 = vld [vmem:[#allocation8 + $0x40] sm:$0xff]  }
  0x54   :  { %408 = vmatprep.subr.bf16.mxu0 %v1349_v15  ;;  %v229_v15 = vrot.slane %v1700_v11, %v228_v10 }
  0x56   :  { %1229 = vmatpush3.bf16.msra.mxu1 %v1388_v0  ;;  %v232_v0 = vsub.s32 1, %v1646_v9 }
  0x57   :  { %409 = vmatpush1.bf16.msra.mxu0 %v1351_v16  ;;  %1230 = vmatprep.subr.bf16.mxu1 %v1389_v1  ;;  %v1151_v1 = vld [vmem:[%s1804_s4] ss:$0 sm:$0xff] }
  0x58   :  { %410 = vmatprep.subr.bf16.mxu0 %v1352_v19 }
  0x5a   :  { %1231 = vmatpush3.bf16.msra.mxu1 %v1390_v2 }
  0x5b   :  { %411 = vmatpush1.bf16.msra.mxu0 %v1354_v28  ;;  %1232 = vmatprep.subr.bf16.mxu1 %v1391_v3 }
  0x5c   :  { %412 = vmatprep.subr.bf16.mxu0 %v1355_v35 }
  0x5e   :  { %1233 = vmatpush3.bf16.msra.mxu1 %v1392_v4 }
  0x5f   :  { %413 = vmatpush2.bf16.msra.mxu0 %v1357_v38  ;;  %1234 = vmatprep.subr.bf16.mxu1 %v1393_v5 }
  0x60   :  { %414 = vmatprep.subr.bf16.mxu0 %v1358_v39 }
  0x62   :  { %1235 = vmatpush3.bf16.msra.mxu1 %v1394_v6 }
  0x63   :  { %415 = vmatpush2.bf16.msra.mxu0 %v1360_v40  ;;  %1248 = vmatprep.subr.bf16.mxu1 %v1395_v7  ;;  %v233_v7 = vrot.slane %v1700_v11, %v232_v0 }
  0x64   :  { %416 = vmatprep.subr.bf16.mxu0 %v1361_v41 }
  0x67   :  { %417 = vmatpush2.bf16.msra.mxu0 %v1363_v42  ;;  %v1396_v42 = vld [vmem:[#allocation8 + $0x38] sm:$0xff]  }
  0x68   :  { %418 = vmatprep.subr.bf16.mxu0 %v1364_v43  ;;  %v1397_v43 = vld [vmem:[#allocation8 + $0x70] sm:$0xff]  }
  0x6b   :  { %419 = vmatpush2.bf16.msra.mxu0 %v1366_v44  ;;  %v1398_v44 = vld [vmem:[#allocation8 + $0x30] sm:$0xff]  }
  0x6c   :  { %420 = vmatprep.subr.bf16.mxu0 %v1367_v45  ;;  %v1399_v45 = vld [vmem:[#allocation8 + $0x68] sm:$0xff]  }
  0x6f   :  { %421 = vmatpush2.bf16.msra.mxu0 %v1369_v46  ;;  %v1400_v46 = vld [vmem:[#allocation8 + $0x28] sm:$0xff]  }
  0x70   :  { %422 = vmatprep.subr.bf16.mxu0 %v1370_v47  ;;  %v1401_v47 = vld [vmem:[#allocation8 + $0x60] sm:$0xff]  }
  0x73   :  { %423 = vmatpush2.bf16.msra.mxu0 %v1372_v48  ;;  %v1403_v48 = vld [vmem:[#allocation8 + $0x58] sm:$0xff]  }
  0x74   :  { %424 = vmatprep.subr.bf16.mxu0 %v1373_v49  ;;  %v1404_v49 = vld [vmem:[#allocation8 + $0x18] sm:$0xff]  }
  0x77   :  { %425 = vmatpush2.bf16.msra.mxu0 %v1375_v50  ;;  %v1405_v50 = vld [vmem:[#allocation8 + $0x50] sm:$0xff]  }
  0x78   :  { %426 = vmatprep.subr.bf16.mxu0 %v1376_v51  ;;  %v1406_v51 = vld [vmem:[#allocation8 + $0x10] sm:$0xff]  }
  0x7b   :  { %427 = vmatpush2.bf16.msra.mxu0 %v1378_v53  ;;  %v1407_v53 = vld [vmem:[#allocation8 + $0x48] sm:$0xff]  }
  0x7e   :  { %429 = vmatmul.mubr.bf16.vlgmr.msra.gmra.mxu0 %v167_v56  ;;  %v1410_v56 = vld [vmem:[#allocation8] sm:$0xff]  }
  0x7f   :  { %1150 = vmatprep.mubr.msk.bf16.mxu0 %vm1688_vm5, %v1149_v57  ;;  %v1411_v57 = vld [vmem:[#allocation10 + $0x78] sm:$0xff]  }
  0x80   :  { %1276 = vmatprep.subr.bf16.mxu0 %v1411_v57 }
  0x81   :  { %1277 = vmatpush3.bf16.msra.mxu0 %v1412_v58 }
  0x86   :  { %439 = vmatmul.mubr.bf16.gmra.mxu0 %v168_v59  ;;  %v1413_v59 = vld [vmem:[#allocation10 + $0x70] sm:$0xff]  }
  0x87   :  { %1278 = vmatprep.subr.bf16.mxu0 %v1413_v59 }
 0x13e   :  { %v430_v8 = vpop.f32.mrf.mxu0 }
 0x13f   :  { %v431_v19 = vadd.f32 %v430_v8, %v229_v15 }
 0x140   :  { %v1702_v13 = vpop.f32.mrf.mxu0 }
 0x141   :  { %v449_v25 = vmax.f32 %v431_v19, 0.0 }
 0x142   :  { %v434_v14 = vpop.f32.mrf.mxu0 }
 0x143   :  { %v435_v17 = vadd.f32 %v434_v14, %v229_v15  ;;  %v455_v30 = vrot.slane %v449_v25, 7 }
 0x144   :  { %v1705_v16 = vpop.f32.mrf.mxu0 }
 0x145   :  { %v450_v22 = vmax.f32 %v435_v17, 0.0  ;;  %v437_v17 = vadd.f32 %v1705_v16, %v233_v7 }
 0x146   :  { %v440_v18 = vpop.f32.mrf.mxu0 }
 0x147   :  { %v441_v20 = vadd.f32 %v440_v18, %v229_v15  ;;  %v456_v28 = vrot.slane %v450_v22, 7  ;;  %v453_v38 = vpack.c.bf16 %v450_v22, %v449_v25 }
 0x148   :  { %v1707_v21 = vpop.f32.mrf.mxu0 }
 0x149   :  { %v451_v26 = vmax.f32 %v441_v20, 0.0  ;;  %v461_v35 = vsel %vm173_vm1, %v455_v30, %v456_v28  ;;  %v433_v20 = vadd.f32 %v1702_v13, %v233_v7 }
 0x14a   :  { %v444_v24 = vpop.f32.mrf.mxu0 }
 0x14b   :  { %v445_v27 = vadd.f32 %v444_v24, %v229_v15  ;;  %v457_v31 = vrot.slane %v451_v26, 7  ;;  %v443_v24 = vadd.f32 %v1707_v21, %v233_v7 }
 0x14d   :  { %v452_v29 = vmax.f32 %v445_v27, 0.0  ;;  %v460_v39 = vsel %vm173_vm1, %v456_v28, %v457_v31  ;;  %v446_v28 = vpop.f32.mrf.mxu0 }
 0x14f   :  { %v458_v32 = vrot.slane %v452_v29, 7  ;;  %v454_v41 = vpack.c.bf16 %v452_v29, %v451_v26 }
 0x151   :  { %v459_v34 = vsel %vm173_vm1, %v457_v31, %v458_v32  ;;  %v462_v36 = vsel %vm173_vm1, %v458_v32, %v455_v30  ;;  %v447_v31 = vadd.f32 %v446_v28, %v233_v7 }
 0x152   :  { %v1169_v37 = vpack.c.bf16 %v461_v35, %v462_v36  ;;  %v1172_v40 = vpack.c.bf16 %v459_v34, %v460_v39 }
 0x154   :  { %1170 = vmatprep.mubr.msk.bf16.mxu1 %vm1661_vm3, %v1169_v37 }
 0x155   :  { %637 = vmatmul.mubr.bf16.vlgmr.msra.gmra.mxu1 %v453_v38 }
 0x156   :  { %1173 = vmatprep.mubr.msk.bf16.mxu1 %vm1688_vm5, %v1172_v40  ;;  %1249 = vmatpush3.bf16.msra.mxu1 %v1396_v42 }
 0x157   :  { %1250 = vmatprep.subr.bf16.mxu1 %v1397_v43 }
 0x15a   :  { %1251 = vmatpush3.bf16.msra.mxu1 %v1398_v44 }
 0x15b   :  { %1252 = vmatprep.subr.bf16.mxu1 %v1399_v45 }
 0x15d   :  { %645 = vmatmul.mubr.bf16.gmra.mxu1 %v454_v41 }
 0x15e   :  { %1253 = vmatpush3.bf16.msra.mxu1 %v1400_v46 }
 0x15f   :  { %1254 = vmatprep.subr.bf16.mxu1 %v1401_v47  ;;  %v1414_v47 = vld [vmem:[#allocation10 + $0x30] sm:$0xff]  }
 0x160   :  { %1279 = vmatpush3.bf16.msra.mxu0 %v1414_v47 }
 0x162   :  { %1255 = vmatpush3.bf16.msra.mxu1 %v1402_v23  ;;  %v1415_v23 = vld [vmem:[#allocation10 + $0x68] sm:$0xff]  }
 0x163   :  { %1256 = vmatprep.subr.bf16.mxu1 %v1403_v48  ;;  %v1416_v48 = vld [vmem:[#allocation10 + $0x28] sm:$0xff]   ;;  %1280 = vmatprep.subr.bf16.mxu0 %v1415_v23 }
 0x164   :  { %1281 = vmatpush3.bf16.msra.mxu0 %v1416_v48 }
 0x166   :  { %1257 = vmatpush3.bf16.msra.mxu1 %v1404_v49  ;;  %v1417_v49 = vld [vmem:[#allocation10 + $0x60] sm:$0xff]  }
 0x167   :  { %1258 = vmatprep.subr.bf16.mxu1 %v1405_v50  ;;  %v1418_v50 = vld [vmem:[#allocation10 + $0x20] sm:$0xff]   ;;  %1282 = vmatprep.subr.bf16.mxu0 %v1417_v49 }
 0x168   :  { %1283 = vmatpush3.bf16.msra.mxu0 %v1418_v50 }
 0x16a   :  { %1259 = vmatpush3.bf16.msra.mxu1 %v1406_v51  ;;  %v1419_v51 = vld [vmem:[#allocation10 + $0x58] sm:$0xff]  }
 0x16b   :  { %1260 = vmatprep.subr.bf16.mxu1 %v1407_v53  ;;  %v1420_v53 = vld [vmem:[#allocation10 + $0x18] sm:$0xff]   ;;  %1284 = vmatprep.subr.bf16.mxu0 %v1419_v51 }
 0x16c   :  { %1285 = vmatpush3.bf16.msra.mxu0 %v1420_v53 }
 0x16e   :  { %1261 = vmatpush3.bf16.msra.mxu1 %v1408_v54  ;;  %v1421_v54 = vld [vmem:[#allocation10 + $0x50] sm:$0xff]  }
 0x16f   :  { %1262 = vmatprep.subr.bf16.mxu1 %v1409_v55  ;;  %v1422_v55 = vld [vmem:[#allocation10 + $0x10] sm:$0xff]   ;;  %1286 = vmatprep.subr.bf16.mxu0 %v1421_v54 }
 0x170   :  { %1287 = vmatpush3.bf16.msra.mxu0 %v1422_v55 }
 0x172   :  { %1263 = vmatpush3.bf16.msra.mxu1 %v1410_v56  ;;  %v1423_v56 = vld [vmem:[#allocation10 + $0x48] sm:$0xff]  }
 0x173   :  { %1304 = vmatprep.subr.bf16.mxu1 %v1411_v57  ;;  %v1424_v57 = vld [vmem:[#allocation10 + $0x8] sm:$0xff]   ;;  %1288 = vmatprep.subr.bf16.mxu0 %v1423_v56 }
 0x174   :  { %1289 = vmatpush3.bf16.msra.mxu0 %v1424_v57 }
 0x215   :  { %v1236_v60 = vpop.f32.mrf.mxu1 }
 0x217   :  { %v1237_v61 = vpop.f32.mrf.mxu1 }
 0x218   :  { %v1238_v63 = vadd.f32 %v1237_v61, %v1236_v60 }
 0x219   :  { %v1239_v62 = vpop.f32.mrf.mxu1 }
 0x21a   :  { %v639_v5 = vadd.f32 %v1238_v63, %v1151_v1 }
 0x21b   :  { %v1240_v2 = vpop.f32.mrf.mxu1 }
 0x21c   :  { %v1241_v3 = vadd.f32 %v1240_v2, %v1239_v62  ;;  %v653_v18 = vmax.f32 %v639_v5, 0.0 }
 0x21d   :  { %v1242_v4 = vpop.f32.mrf.mxu1 }
 0x21e   :  { %v642_v6 = vadd.f32 %v1241_v3, %v1151_v1  ;;  %v657_v29 = vadd.f32 %v653_v18, %v433_v20  ;;  %v1174_v3 = vld [vmem:[%s1806_s6] ss:$0 sm:$0xff] }
 0x21f   :  { %v1243_v8 = vpop.f32.mrf.mxu1 }
 0x220   :  { %v654_v10 = vmax.f32 %v642_v6, 0.0  ;;  %v1244_v14 = vadd.f32 %v1243_v8, %v1242_v4  ;;  %v1731_v35 = vmax.f32 %v657_v29, 0.0 }
 0x221   :  { %v1245_v15 = vpop.f32.mrf.mxu1 }
 0x222   :  { %v647_v19 = vadd.f32 %v1244_v14, %v1151_v1  ;;  %v658_v25 = vadd.f32 %v654_v10, %v437_v17  ;;  %v667_v21 = vrot.slane %v1731_v35, 6 }
 0x223   :  { %v1246_v22 = vpop.f32.mrf.mxu1 }
 0x224   :  { %v655_v26 = vmax.f32 %v647_v19, 0.0  ;;  %v1247_v27 = vadd.f32 %v1246_v22, %v1245_v15  ;;  %v1729_v32 = vmax.f32 %v658_v25, 0.0 }
 0x226   :  { %v659_v30 = vadd.f32 %v655_v26, %v443_v24  ;;  %v650_v11 = vadd.f32 %v1247_v27, %v1151_v1  ;;  %v668_v13 = vrot.slane %v1729_v32, 6  ;;  %v665_v44 = vpack.c.bf16 %v1729_v32, %v1731_v35 }
 0x228   :  { %v656_v34 = vmax.f32 %v650_v11, 0.0  ;;  %v1733_v16 = vmax.f32 %v659_v30, 0.0  ;;  %v674_v40 = vsel %vm671_vm7, %v667_v21, %v668_v13 }
 0x22a   :  { %v660_v36 = vadd.f32 %v656_v34, %v447_v31  ;;  %v669_v38 = vrot.slane %v1733_v16, 6 }
 0x22c   :  { %v1736_v37 = vmax.f32 %v660_v36, 0.0  ;;  %v673_v33 = vsel %vm671_vm7, %v668_v13, %v669_v38 }
 0x22e   :  { %v670_v39 = vrot.slane %v1736_v37, 6  ;;  %v666_v46 = vpack.c.bf16 %v1736_v37, %v1733_v16 }
 0x230   :  { %v675_v41 = vsel %vm671_vm7, %v670_v39, %v667_v21  ;;  %v672_v42 = vsel %vm671_vm7, %v669_v38, %v670_v39  ;;  %v1197_v39 = vld [vmem:[%s1808_s8] ss:$0 sm:$0xff]  ;;  %s1565_s8 = smov [#allocation11]  }
 0x231   :  { %v1192_v43 = vpack.c.bf16 %v674_v40, %v675_v41  ;;  %v1195_v45 = vpack.c.bf16 %v672_v42, %v673_v33  ;;  %s1099_s19 = sshll.u32 %s1565_s8, 4  ;;  %s1100_s19 = int_to_ptr.vmem [resolvable:$true] %s1099_s19 }
 0x232   :  { %s1527_s20 = scalar_lea.vmem %s1100_s19, 512  ;;  %p1532_p12 = scmp.lt.s32.totalorder %s1100_s19, %s1100_s19 }
 0x233   :  { %1193 = vmatprep.mubr.msk.bf16.mxu1 %vm1751_vm9, %v1192_v43  ;;  %p1528_p11 = scmp.ne.s32.totalorder %s1100_s19, %s1527_s20  ;;  %p1533_p13 = scmp.lt.s32.totalorder %s1527_s20, %s1527_s20 }
 0x234   :  { %858 = vmatmul.mubr.bf16.vlgmr.msra.gmra.mxu1 %v665_v44 }
 0x235   :  { %1196 = vmatprep.mubr.msk.bf16.mxu1 %vm1762_vm10, %v1195_v45  ;;  %1312 = vmatpush3.bf16.msra.mxu1 %v1412_v58  ;;  %v1425_v58 = vld [vmem:[#allocation10 + $0x40] sm:$0xff]   ;;  %p1534_p0 = por %p1533_p13, %p1532_p12 }
 0x236   :  { %1305 = vmatprep.subr.bf16.mxu1 %v1413_v59  ;;  %v1426_v59 = vld [vmem:[#allocation10] sm:$0xff]   ;;  %1290 = vmatprep.subr.bf16.mxu0 %v1425_v58 }
 0x237   :  { %1291 = vmatpush3.bf16.msra.mxu0 %v1426_v59  ;;  %p1535_p1 = pnand %p1534_p0, %p1528_p11 }
 0x239   :  { %1313 = vmatpush3.bf16.msra.mxu1 %v1414_v47 }
 0x23a   :  { %1306 = vmatprep.subr.bf16.mxu1 %v1415_v23 }
 0x23c   :  { %866 = vmatmul.mubr.bf16.gmra.mxu1 %v666_v46 }
 0x23d   :  { %1314 = vmatpush3.bf16.msra.mxu1 %v1416_v48 }
 0x23e   :  { %1307 = vmatprep.subr.bf16.mxu1 %v1417_v49 }
 0x241   :  { %1315 = vmatpush3.bf16.msra.mxu1 %v1418_v50 }
 0x242   :  { %1308 = vmatprep.subr.bf16.mxu1 %v1419_v51 }
 0x245   :  { %1316 = vmatpush3.bf16.msra.mxu1 %v1420_v53 }
 0x246   :  { %1309 = vmatprep.subr.bf16.mxu1 %v1421_v54 }
 0x249   :  { %1317 = vmatpush3.bf16.msra.mxu1 %v1422_v55 }
 0x24a   :  { %1310 = vmatprep.subr.bf16.mxu1 %v1423_v56 }
 0x24d   :  { %1318 = vmatpush3.bf16.msra.mxu1 %v1424_v57 }
 0x24e   :  { %1311 = vmatprep.subr.bf16.mxu1 %v1425_v58 }
 0x251   :  { %1319 = vmatpush3.bf16.msra.mxu1 %v1426_v59 }
 0x2f4   :  { %v1264_v60 = vpop.f32.mrf.mxu1 }
 0x2f6   :  { %v1265_v61 = vpop.f32.mrf.mxu1 }
 0x2f7   :  { %v1266_v2 = vadd.f32 %v1265_v61, %v1264_v60 }
 0x2f8   :  { %v1267_v62 = vpop.f32.mrf.mxu1 }
 0x2f9   :  { %v860_v8 = vadd.f32 %v1266_v2, %v1174_v3 }
 0x2fa   :  { %v1268_v63 = vpop.f32.mrf.mxu1 }
 0x2fb   :  { %v1269_v0 = vadd.f32 %v1268_v63, %v1267_v62  ;;  %v874_v19 = vmax.f32 %v860_v8, 0.0 }
 0x2fc   :  { %v1270_v1 = vpop.f32.mrf.mxu1 }
 0x2fd   :  { %v863_v5 = vadd.f32 %v1269_v0, %v1174_v3  ;;  %v880_v26 = vrot.slane %v874_v19, 6 }
 0x2fe   :  { %v1271_v4 = vpop.f32.mrf.mxu1 }
 0x2ff   :  { %v1272_v6 = vadd.f32 %v1271_v4, %v1270_v1  ;;  %v875_v15 = vmax.f32 %v863_v5, 0.0 }
 0x300   :  { %v1273_v7 = vpop.f32.mrf.mxu1 }
 0x301   :  { %v868_v10 = vadd.f32 %v1272_v6, %v1174_v3  ;;  %v881_v22 = vrot.slane %v875_v15, 6  ;;  %v878_v36 = vpack.c.bf16 %v875_v15, %v874_v19 }
 0x302   :  { %v1274_v14 = vpop.f32.mrf.mxu1 }
 0x303   :  { %v876_v17 = vmax.f32 %v868_v10, 0.0  ;;  %v1275_v18 = vadd.f32 %v1274_v14, %v1273_v7  ;;  %v886_v28 = vsel %vm671_vm7, %v880_v26, %v881_v22 }
 0x305   :  { %v871_v20 = vadd.f32 %v1275_v18, %v1174_v3  ;;  %v882_v24 = vrot.slane %v876_v17, 6 }
 0x307   :  { %v877_v25 = vmax.f32 %v871_v20, 0.0  ;;  %v885_v11 = vsel %vm671_vm7, %v881_v22, %v882_v24 }
 0x309   :  { %v883_v27 = vrot.slane %v877_v25, 6  ;;  %v879_v13 = vpack.c.bf16 %v877_v25, %v876_v17 }
 0x30b   :  { %v887_v29 = vsel %vm671_vm7, %v883_v27, %v880_v26  ;;  %v884_v30 = vsel %vm671_vm7, %v882_v24, %v883_v27 }
 0x30c   :  { %v1215_v31 = vpack.c.bf16 %v886_v28, %v887_v29  ;;  %v1218_v34 = vpack.c.bf16 %v884_v30, %v885_v11 }
 0x30e   :  { %1216 = vmatprep.mubr.msk.bf16.mxu0 %vm1751_vm9, %v1215_v31  ;;  %1219 = vmatprep.mubr.msk.bf16.mxu1 %vm1762_vm10, %v1218_v34 }
 0x30f   :  { %1062 = vmatmul.mubr.bf16.vlgmr.msra.gmra.mxu0 %v878_v36  ;;  %1070 = vmatmul.mubr.bf16.vlgmr.msra.gmra.mxu1 %v879_v13 }
 0x3cf   :  { %v1292_v21 = vpop.f32.mrf.mxu0  ;;  %v1298_v38 = vpop.f32.mrf.mxu1 }
 0x3d1   :  { %v1293_v9 = vpop.f32.mrf.mxu0  ;;  %v1299_v40 = vpop.f32.mrf.mxu1 }
 0x3d2   :  { %v1294_v41 = vadd.f32 %v1293_v9, %v1292_v21  ;;  %v1300_v42 = vadd.f32 %v1299_v40, %v1298_v38 }
 0x3d3   :  { %v1295_v43 = vpop.f32.mrf.mxu0  ;;  %v1301_v44 = vpop.f32.mrf.mxu1 }
 0x3d4   :  { %v1064_v33 = vadd.f32 %v1294_v41, %v1197_v39  ;;  %v1072_v12 = vadd.f32 %v1300_v42, %v1197_v39 }
 0x3d5   :  { %v1296_v45 = vpop.f32.mrf.mxu0  ;;  %v1302_v46 = vpop.f32.mrf.mxu1 }
 0x3d6   :  { %v1078_v52 = vmax.f32 %v1064_v33, 0.0  ;;  %v1080_v47 = vmax.f32 %v1072_v12, 0.0  ;;  %v1297_v23 = vadd.f32 %v1296_v45, %v1295_v43  ;;  %v1303_v48 = vadd.f32 %v1302_v46, %v1301_v44 }
 0x3d8   :  { %v1082_v49 = vadd.f32 %v1078_v52, %v1731_v35  ;;  %v1084_v50 = vadd.f32 %v1080_v47, %v1733_v16  ;;  %v1067_v51 = vadd.f32 %v1297_v23, %v1197_v39  ;;  %v1075_v53 = vadd.f32 %v1303_v48, %v1197_v39 }
 0x3da   :  { %v1086_v54 = vmax.f32 %v1082_v49, 0.0  ;;  %v1088_v55 = vmax.f32 %v1084_v50, 0.0  ;;  %v1079_v56 = vmax.f32 %v1067_v51, 0.0  ;;  %v1081_v57 = vmax.f32 %v1075_v53, 0.0 }
 0x3dc   :  { %1090 = vst [vmem:[#allocation11] sm:$0xff] %v1086_v54  ;;  %1092 = vst [vmem:[#allocation11 + $0x10] sm:$0xff] %v1088_v55  ;;  %v1083_v58 = vadd.f32 %v1079_v56, %v1729_v32  ;;  %v1085_v59 = vadd.f32 %v1081_v57, %v1736_v37 }
 0x3de   :  { %v1087_v60 = vmax.f32 %v1083_v58, 0.0  ;;  %v1089_v61 = vmax.f32 %v1085_v59, 0.0 }
 0x3e0   :  { %1091 = vst [vmem:[#allocation11 + $0x8] sm:$0xff] %v1087_v60  ;;  %1093 = vst [vmem:[#allocation11 + $0x18] sm:$0xff] %v1089_v61 }
 0x3e1   :  { %1538 = shalt.err (!%p1535_p1)
}
 0x3e2   :  { %1105 = dma.vmem_to_hbm [thread:$0]  %s1100_s19, 512, %s1809_s9, [#allocation4], %s1556_s12, %s1556_s12, %s1557_s13  }
 0x3e3   :  { %1553 = dma.done.wait [#allocation4], 512  }
 0x3e4   :  { %1554 = vsyncadd [#allocation4], 4294966784 }
 0x3e5   :  { %1109 = vsyncpa [#allocation3], 1 }
 0x3e6   :  { %1110 = vsyncpa [#allocation6], 1 }
 0x3e7   :  { %1111 = vsyncpa [#allocation9], 1 }
 0x3e8   :  { %1112 = vsyncpa [#allocation4], 1 }

</bundles_post_ra>
